<compile_context>
chip_gen: v6e
topology: v6e:2x2x1
jax: 0.10.0
libtpu: 0.0.40
codegen_flags: <defaults>
</compile_context>

<pallas_src>
import functools
import math

import jax
import jax.numpy as jnp
from jax.experimental import pallas as pl
from jax.experimental.pallas import tpu as pltpu


# ---------------------------------------------------------------------------
# In-kernel helpers (pure functions on VMEM-resident values)
# ---------------------------------------------------------------------------

def _layernorm(x, g, b, eps=1e-12):
    mu = jnp.mean(x, axis=-1, keepdims=True)
    xc = x - mu
    var = jnp.mean(xc * xc, axis=-1, keepdims=True)
    return xc * jax.lax.rsqrt(var + eps) * g + b


def _gelu(y):
    # TODO(synk): HF 'gelu' is the exact erf-based variant; tanh approximation
    #             is used here (safe Mosaic lowering, tiny numeric difference).
    c = math.sqrt(2.0 / math.pi)
    return 0.5 * y * (1.0 + jnp.tanh(c * (y + 0.044715 * y * y * y)))


# ---------------------------------------------------------------------------
# Fused BERT forward kernel: grid=(n_layers,), activations resident in VMEM
# ---------------------------------------------------------------------------

def bert_fused_kernel(
    # constant inputs (same block every grid step)
    emb_ref, addmask_ref, emb_g_ref, emb_b_ref,
    pool_w_ref, pool_b_ref, fc_w_ref,
    # per-layer stacked weights (block index = layer id -> pipelined prefetch)
    wqkv_ref, bqkv_ref, wo_ref, bo_ref,
    ln1_g_ref, ln1_b_ref, w1_ref, b1_ref, w2_ref, b2_ref,
    ln2_g_ref, ln2_b_ref,
    # output
    out_ref,
    # scratch: activation slab, persists across grid iterations
    x_scr,
    *, B, S, H, nh):
    hd = H // nh
    scale = 1.0 / math.sqrt(hd)
    layer = pl.program_id(0)

    # ---- first grid step: embeddings LayerNorm -> resident activations ----
    @pl.when(layer == 0)
    def _():
        x_scr[...] = _layernorm(emb_ref[...], emb_g_ref[...], emb_b_ref[...])

    x = x_scr[...]                                        # [B*S, H] float32

    # ---- fused Q/K/V projection (single [H, 3H] matmul) ----
    qkv = jnp.dot(x, wqkv_ref[...], preferred_element_type=jnp.float32)
    qkv = qkv + bqkv_ref[...]
    q = qkv[:, 0 * H:1 * H].reshape(B, S, H)
    k = qkv[:, 1 * H:2 * H].reshape(B, S, H)
    v = qkv[:, 2 * H:3 * H].reshape(B, S, H)

    # additive mask broadcast in-kernel: [B, S] -> [B, 1, S]
    amask = addmask_ref[...][:, None, :]

    # ---- multi-head attention; heads sliced on the lane axis (unrolled) ----
    ctx_heads = []
    for h in range(nh):
        sl = slice(h * hd, (h + 1) * hd)
        qh, kh, vh = q[:, :, sl], k[:, :, sl], v[:, :, sl]
        s = jnp.einsum("bqd,bkd->bqk", qh, kh,
                       preferred_element_type=jnp.float32) * scale + amask
        m = jnp.max(s, axis=-1, keepdims=True)
        p = jnp.exp(s - m)
        p = p * pl.reciprocal(jnp.sum(p, axis=-1, keepdims=True), approx=True)
        ctx_heads.append(jnp.einsum("bqk,bkd->bqd", p, vh,
                                    preferred_element_type=jnp.float32))
    ctx = jnp.concatenate(ctx_heads, axis=-1).reshape(B * S, H)

    # ---- output projection, residual folded into LayerNorm ----
    attn_out = jnp.dot(ctx, wo_ref[...], preferred_element_type=jnp.float32)
    attn_out = attn_out + bo_ref[...]
    x1 = _layernorm(attn_out + x, ln1_g_ref[...], ln1_b_ref[...])

    # ---- FFN (GELU), residual folded into LayerNorm ----
    ff = jnp.dot(x1, w1_ref[...], preferred_element_type=jnp.float32) + b1_ref[...]
    ff = _gelu(ff)
    ff = jnp.dot(ff, w2_ref[...], preferred_element_type=jnp.float32) + b2_ref[...]
    x2 = _layernorm(ff + x1, ln2_g_ref[...], ln2_b_ref[...])
    x_scr[...] = x2

    # ---- last layer: pooler (tanh over [CLS]) + fc head (sigmoid) ----
    @pl.when(layer == pl.num_programs(0) - 1)
    def _():
        # [CLS] rows are at 0, S, 2S, ...  (B is tiny & static -> plain slices)
        cls = jnp.concatenate([x2[b * S:b * S + 1, :] for b in range(B)], axis=0)
        pooled = jnp.tanh(
            jnp.dot(cls, pool_w_ref[...], preferred_element_type=jnp.float32)
            + pool_b_ref[...])
        # Dropout(0.5) is identity in eval mode
        logit = jnp.dot(pooled, fc_w_ref[...], preferred_element_type=jnp.float32)
        out_ref[...] = 1.0 / (1.0 + jnp.exp(-logit))


# ---------------------------------------------------------------------------
# Deterministic parameter initialization (per-layer weights stacked on axis 0)
# ---------------------------------------------------------------------------

def init_params(key, *, vocab=128, hidden=32, n_layers=2, heads=4,
                intermediate=128, max_pos=16, type_vocab=2):
    std = 0.02

    def normal(k, shape):
        return jax.random.normal(k, shape, dtype=jnp.float32) * std

    keys = jax.random.split(key, 8 + n_layers)
    params = {
        "word_emb": normal(keys[0], (vocab, hidden)),
        "pos_emb": normal(keys[1], (max_pos, hidden)),
        "type_emb": normal(keys[2], (type_vocab, hidden)),
        "emb_ln_g": jnp.ones((1, hidden), jnp.float32),
        "emb_ln_b": jnp.zeros((1, hidden), jnp.float32),
        "pool_w": normal(keys[3], (hidden, hidden)),
        "pool_b": jnp.zeros((1, hidden), jnp.float32),
        # Linear(hidden, 1, bias=False), stored as W^T
        "fc_w": normal(keys[4], (hidden, 1)),
    }

    names = ["wqkv", "bqkv", "wo", "bo", "ln1_g", "ln1_b",
             "w1", "b1", "w2", "b2", "ln2_g", "ln2_b"]
    layers = {n: [] for n in names}
    for li in range(n_layers):
        lk = jax.random.split(keys[8 + li], 6)
        wq = normal(lk[0], (hidden, hidden))
        wk = normal(lk[1], (hidden, hidden))
        wv = normal(lk[2], (hidden, hidden))
        layers["wqkv"].append(jnp.concatenate([wq, wk, wv], axis=1))   # [H, 3H]
        layers["bqkv"].append(jnp.zeros((1, 3 * hidden), jnp.float32))
        layers["wo"].append(normal(lk[3], (hidden, hidden)))
        layers["bo"].append(jnp.zeros((1, hidden), jnp.float32))
        layers["ln1_g"].append(jnp.ones((1, hidden), jnp.float32))
        layers["ln1_b"].append(jnp.zeros((1, hidden), jnp.float32))
        layers["w1"].append(normal(lk[4], (hidden, intermediate)))
        layers["b1"].append(jnp.zeros((1, intermediate), jnp.float32))
        layers["w2"].append(normal(lk[5], (intermediate, hidden)))
        layers["b2"].append(jnp.zeros((1, hidden), jnp.float32))
        layers["ln2_g"].append(jnp.ones((1, hidden), jnp.float32))
        layers["ln2_b"].append(jnp.zeros((1, hidden), jnp.float32))
    params["layers"] = {n: jnp.stack(v, axis=0) for n, v in layers.items()}
    return params


# ---------------------------------------------------------------------------
# Forward pass: one fused pallas_call (embedding gathers stay as JAX glue)
# ---------------------------------------------------------------------------

def my_model_forward(params, input_ids, attn_masks, token_type, *, heads):
    B, S = input_ids.shape
    H = params["emb_ln_g"].shape[-1]
    I = params["layers"]["w1"].shape[-1]
    L = params["layers"]["wqkv"].shape[0]
    BS = B * S

    # BERT embeddings: data-dependent table gathers (JAX glue, not Pallas)
    emb = (jnp.take(params["word_emb"], input_ids, axis=0)
           + params["pos_emb"][None, :S, :]
           + jnp.take(params["type_emb"], token_type, axis=0)).reshape(BS, H)
    # HF additive mask convention: (1 - mask) * -10000, passed as compact [B, S]
    addmask = (1.0 - attn_masks.astype(jnp.float32)) * -10000.0

    def const_spec(shape):
        return pl.BlockSpec(shape, lambda l: (0,) * len(shape))

    def layer_spec(shape):
        return pl.BlockSpec((None,) + shape, lambda l: (l,) + (0,) * len(shape))

    Lw = params["layers"]

    grid_spec = pltpu.PrefetchScalarGridSpec(
        num_scalar_prefetch=0,
        grid=(L,),
        in_specs=[
            const_spec((BS, H)),            # emb
            const_spec((B, S)),             # additive mask
            const_spec((1, H)),             # emb_ln_g
            const_spec((1, H)),             # emb_ln_b
            const_spec((H, H)),             # pool_w
            const_spec((1, H)),             # pool_b
            const_spec((H, 1)),             # fc_w
            layer_spec((H, 3 * H)),         # wqkv
            layer_spec((1, 3 * H)),         # bqkv
            layer_spec((H, H)),             # wo
            layer_spec((1, H)),             # bo
            layer_spec((1, H)),             # ln1_g
            layer_spec((1, H)),             # ln1_b
            layer_spec((H, I)),             # w1
            layer_spec((1, I)),             # b1
            layer_spec((I, H)),             # w2
            layer_spec((1, H)),             # b2
            layer_spec((1, H)),             # ln2_g
            layer_spec((1, H)),             # ln2_b
        ],
        out_specs=pl.BlockSpec((B, 1), lambda l: (0, 0)),
        scratch_shapes=[pltpu.VMEM((BS, H), jnp.float32)],
    )

    kernel = functools.partial(bert_fused_kernel, B=B, S=S, H=H, nh=heads)
    out = pl.pallas_call(
        kernel,
        out_shape=jax.ShapeDtypeStruct((B, 1), jnp.float32),
        grid_spec=grid_spec,
        compiler_params=pltpu.CompilerParams(
            dimension_semantics=("arbitrary",)),   # sequential layer dependence
    )(emb, addmask, params["emb_ln_g"], params["emb_ln_b"],
      params["pool_w"], params["pool_b"], params["fc_w"],
      Lw["wqkv"], Lw["bqkv"], Lw["wo"], Lw["bo"],
      Lw["ln1_g"], Lw["ln1_b"], Lw["w1"], Lw["b1"], Lw["w2"], Lw["b2"],
      Lw["ln2_g"], Lw["ln2_b"])
    return out


# ---------------------------------------------------------------------------
if __name__ == "__main__":
    key = jax.random.PRNGKey(0)
    pkey, ikey = jax.random.split(key, 2)

    B, S, VOCAB = 2, 8, 128
    params = init_params(pkey, vocab=VOCAB, hidden=32, n_layers=2, heads=4,
                         intermediate=128, max_pos=16, type_vocab=2)

    input_ids = jax.random.randint(ikey, (B, S), 0, VOCAB, dtype=jnp.int32)
    attn_masks = jnp.ones((B, S), dtype=jnp.int32).at[:, S - 2:].set(0)   # pad last 2
    token_type = jnp.zeros((B, S), dtype=jnp.int32).at[:, S // 2:].set(1)

    fwd = jax.jit(functools.partial(my_model_forward, heads=4))
    out = jax.block_until_ready(fwd(params, input_ids, attn_masks, token_type))

    assert out.shape == (B, 1)
    assert bool(jnp.all((out >= 0.0) & (out <= 1.0)))
    print("KERNEL_OK")
</pallas_src>

<mosaic_0001>
module attributes {stable_mosaic.version = 11 : i64} {
  func.func @bert_fused_kernel(%arg0: i32, %arg1: memref<16x32xf32, #tpu.memory_space<vmem>>, %arg2: memref<2x8xf32, #tpu.memory_space<vmem>>, %arg3: memref<1x32xf32, #tpu.memory_space<vmem>>, %arg4: memref<1x32xf32, #tpu.memory_space<vmem>>, %arg5: memref<32x32xf32, #tpu.memory_space<vmem>>, %arg6: memref<1x32xf32, #tpu.memory_space<vmem>>, %arg7: memref<32x1xf32, #tpu.memory_space<vmem>>, %arg8: memref<1x32x96xf32, #tpu.memory_space<vmem>>, %arg9: memref<1x1x96xf32, #tpu.memory_space<vmem>>, %arg10: memref<1x32x32xf32, #tpu.memory_space<vmem>>, %arg11: memref<1x1x32xf32, #tpu.memory_space<vmem>>, %arg12: memref<1x1x32xf32, #tpu.memory_space<vmem>>, %arg13: memref<1x1x32xf32, #tpu.memory_space<vmem>>, %arg14: memref<1x32x128xf32, #tpu.memory_space<vmem>>, %arg15: memref<1x1x128xf32, #tpu.memory_space<vmem>>, %arg16: memref<1x128x32xf32, #tpu.memory_space<vmem>>, %arg17: memref<1x1x32xf32, #tpu.memory_space<vmem>>, %arg18: memref<1x1x32xf32, #tpu.memory_space<vmem>>, %arg19: memref<1x1x32xf32, #tpu.memory_space<vmem>>, %arg20: memref<2x1xf32, #tpu.memory_space<vmem>>, %arg21: memref<16x32xf32, #tpu.memory_space<vmem>>) attributes {dimension_semantics = [#tpu.dimension_semantics<arbitrary>], iteration_bounds = array<i64: 2>, scalar_prefetch = 0 : i64, scratch_operands = 1 : i64, tpu.core_type = #tpu.core_type<tc>, window_params = [{pipeline_mode = #tpu.pipeline_mode<synchronous>, transform_indices = @transform_0, window_bounds = array<i64: 16, 32>}, {pipeline_mode = #tpu.pipeline_mode<synchronous>, transform_indices = @transform_1, window_bounds = array<i64: 2, 8>}, {pipeline_mode = #tpu.pipeline_mode<synchronous>, transform_indices = @transform_2, window_bounds = array<i64: 1, 32>}, {pipeline_mode = #tpu.pipeline_mode<synchronous>, transform_indices = @transform_3, window_bounds = array<i64: 1, 32>}, {pipeline_mode = #tpu.pipeline_mode<synchronous>, transform_indices = @transform_4, window_bounds = array<i64: 32, 32>}, {pipeline_mode = #tpu.pipeline_mode<synchronous>, transform_indices = @transform_5, window_bounds = array<i64: 1, 32>}, {pipeline_mode = #tpu.pipeline_mode<synchronous>, transform_indices = @transform_6, window_bounds = array<i64: 32, 1>}, {transform_indices = @transform_7, window_bounds = array<i64: 1, 32, 96>}, {transform_indices = @transform_8, window_bounds = array<i64: 1, 1, 96>}, {transform_indices = @transform_9, window_bounds = array<i64: 1, 32, 32>}, {transform_indices = @transform_10, window_bounds = array<i64: 1, 1, 32>}, {transform_indices = @transform_11, window_bounds = array<i64: 1, 1, 32>}, {transform_indices = @transform_12, window_bounds = array<i64: 1, 1, 32>}, {transform_indices = @transform_13, window_bounds = array<i64: 1, 32, 128>}, {transform_indices = @transform_14, window_bounds = array<i64: 1, 1, 128>}, {transform_indices = @transform_15, window_bounds = array<i64: 1, 128, 32>}, {transform_indices = @transform_16, window_bounds = array<i64: 1, 1, 32>}, {transform_indices = @transform_17, window_bounds = array<i64: 1, 1, 32>}, {transform_indices = @transform_18, window_bounds = array<i64: 1, 1, 32>}, {pipeline_mode = #tpu.pipeline_mode<synchronous>, transform_indices = @transform_19, window_bounds = array<i64: 2, 1>}]} {
    %c0_i32 = arith.constant 0 : i32
    %0 = arith.cmpi eq, %arg0, %c0_i32 : i32
    %1 = arith.extui %0 : i1 to i32
    %c0_i32_0 = arith.constant 0 : i32
    %2 = arith.cmpi ne, %1, %c0_i32_0 : i32
    scf.if %2 {
      %c0_80 = arith.constant 0 : index
      %c0_81 = arith.constant 0 : index
      %185 = vector.load %arg1[%c0_80, %c0_81] : memref<16x32xf32, #tpu.memory_space<vmem>>, vector<16x32xf32>
      %c0_82 = arith.constant 0 : index
      %c0_83 = arith.constant 0 : index
      %186 = vector.load %arg3[%c0_82, %c0_83] : memref<1x32xf32, #tpu.memory_space<vmem>>, vector<1x32xf32>
      %c0_84 = arith.constant 0 : index
      %c0_85 = arith.constant 0 : index
      %187 = vector.load %arg4[%c0_84, %c0_85] : memref<1x32xf32, #tpu.memory_space<vmem>>, vector<1x32xf32>
      %cst_86 = arith.constant dense<0.000000e+00> : vector<16xf32>
      %188 = vector.multi_reduction <add>, %185, %cst_86 [1] : vector<16x32xf32> to vector<16xf32>
      %189 = vector.shape_cast %188 : vector<16xf32> to vector<16x1xf32>
      %cst_87 = arith.constant 3.200000e+01 : f32
      %190 = vector.broadcast %cst_87 : f32 to vector<16x1xf32>
      %191 = arith.divf %189, %190 : vector<16x1xf32>
      %192 = vector.broadcast %191 : vector<16x1xf32> to vector<16x32xf32>
      %193 = arith.subf %185, %192 : vector<16x32xf32>
      %194 = arith.mulf %193, %193 : vector<16x32xf32>
      %cst_88 = arith.constant dense<0.000000e+00> : vector<16xf32>
      %195 = vector.multi_reduction <add>, %194, %cst_88 [1] : vector<16x32xf32> to vector<16xf32>
      %196 = vector.shape_cast %195 : vector<16xf32> to vector<16x1xf32>
      %cst_89 = arith.constant 3.200000e+01 : f32
      %197 = vector.broadcast %cst_89 : f32 to vector<16x1xf32>
      %198 = arith.divf %196, %197 : vector<16x1xf32>
      %cst_90 = arith.constant 9.99999996E-13 : f32
      %199 = vector.broadcast %cst_90 : f32 to vector<16x1xf32>
      %200 = arith.addf %198, %199 : vector<16x1xf32>
      %201 = math.rsqrt %200 : vector<16x1xf32>
      %202 = vector.broadcast %201 : vector<16x1xf32> to vector<16x32xf32>
      %203 = arith.mulf %193, %202 : vector<16x32xf32>
      %204 = vector.broadcast %186 : vector<1x32xf32> to vector<16x32xf32>
      %205 = arith.mulf %203, %204 : vector<16x32xf32>
      %206 = vector.broadcast %187 : vector<1x32xf32> to vector<16x32xf32>
      %207 = arith.addf %205, %206 : vector<16x32xf32>
      %c0_91 = arith.constant 0 : index
      %c0_92 = arith.constant 0 : index
      %208 = vector.load %arg21[%c0_91, %c0_92] : memref<16x32xf32, #tpu.memory_space<vmem>>, vector<16x32xf32>
      tpu.vector_store %arg21[%c0_91, %c0_92], %207 {strides = array<i32>} : memref<16x32xf32, #tpu.memory_space<vmem>>, vector<16x32xf32>,
    } else {
    }
    %c0 = arith.constant 0 : index
    %c0_1 = arith.constant 0 : index
    %3 = vector.load %arg21[%c0, %c0_1] : memref<16x32xf32, #tpu.memory_space<vmem>>, vector<16x32xf32>
    %c0_2 = arith.constant 0 : index
    %c0_3 = arith.constant 0 : index
    %c0_4 = arith.constant 0 : index
    %4 = vector.load %arg8[%c0_2, %c0_3, %c0_4] : memref<1x32x96xf32, #tpu.memory_space<vmem>>, vector<1x32x96xf32>
    %5 = vector.shape_cast %4 : vector<1x32x96xf32> to vector<32x96xf32>
    %cst = arith.constant dense<0.000000e+00> : vector<16x96xf32>
    %6 = tpu.matmul %3, %5, %cst {dimension_numbers = #tpu.dot_dimension_numbers<[1], [0], [0], [1], [0, 0, 1, 1], [], []>} : vector<16x32xf32>, vector<32x96xf32>, vector<16x96xf32> -> vector<16x96xf32>
    %c0_5 = arith.constant 0 : index
    %c0_6 = arith.constant 0 : index
    %c0_7 = arith.constant 0 : index
    %7 = vector.load %arg9[%c0_5, %c0_6, %c0_7] : memref<1x1x96xf32, #tpu.memory_space<vmem>>, vector<1x1x96xf32>
    %8 = vector.shape_cast %7 : vector<1x1x96xf32> to vector<1x96xf32>
    %9 = vector.broadcast %8 : vector<1x96xf32> to vector<16x96xf32>
    %10 = arith.addf %6, %9 : vector<16x96xf32>
    %11 = vector.extract_strided_slice %10 {offsets = [0, 0], sizes = [16, 32], strides = [1, 1]} : vector<16x96xf32> to vector<16x32xf32>
    %12 = vector.shape_cast %11 : vector<16x32xf32> to vector<2x8x32xf32>
    %13 = vector.extract_strided_slice %10 {offsets = [0, 32], sizes = [16, 32], strides = [1, 1]} : vector<16x96xf32> to vector<16x32xf32>
    %14 = vector.shape_cast %13 : vector<16x32xf32> to vector<2x8x32xf32>
    %15 = vector.extract_strided_slice %10 {offsets = [0, 64], sizes = [16, 32], strides = [1, 1]} : vector<16x96xf32> to vector<16x32xf32>
    %16 = vector.shape_cast %15 : vector<16x32xf32> to vector<2x8x32xf32>
    %c0_8 = arith.constant 0 : index
    %c0_9 = arith.constant 0 : index
    %17 = vector.load %arg2[%c0_8, %c0_9] : memref<2x8xf32, #tpu.memory_space<vmem>>, vector<2x8xf32>
    %18 = vector.shape_cast %17 : vector<2x8xf32> to vector<2x1x8xf32>
    %19 = vector.extract_strided_slice %12 {offsets = [0, 0, 0], sizes = [2, 8, 8], strides = [1, 1, 1]} : vector<2x8x32xf32> to vector<2x8x8xf32>
    %20 = vector.extract_strided_slice %14 {offsets = [0, 0, 0], sizes = [2, 8, 8], strides = [1, 1, 1]} : vector<2x8x32xf32> to vector<2x8x8xf32>
    %21 = vector.extract_strided_slice %16 {offsets = [0, 0, 0], sizes = [2, 8, 8], strides = [1, 1, 1]} : vector<2x8x32xf32> to vector<2x8x8xf32>
    "tpu.trace_start"() <{level = 10 : i32, message = "bqd,bkd->bqk"}> : () -> ()
    %cst_10 = arith.constant dense<0.000000e+00> : vector<2x8x8xf32>
    %22 = tpu.matmul %19, %20, %cst_10 {dimension_numbers = #tpu.dot_dimension_numbers<[2], [2], [1], [1], [0, 0, 0, 1, 1, 1], [0], [0]>} : vector<2x8x8xf32>, vector<2x8x8xf32>, vector<2x8x8xf32> -> vector<2x8x8xf32>
    "tpu.trace_stop"() : () -> ()
    %cst_11 = arith.constant 0.353553385 : f32
    %23 = vector.broadcast %cst_11 : f32 to vector<2x8x8xf32>
    %24 = arith.mulf %22, %23 : vector<2x8x8xf32>
    %25 = vector.broadcast %18 : vector<2x1x8xf32> to vector<2x8x8xf32>
    %26 = arith.addf %24, %25 : vector<2x8x8xf32>
    %cst_12 = arith.constant dense<0xFF800000> : vector<2x8xf32>
    %27 = vector.multi_reduction <maximumf>, %26, %cst_12 [2] : vector<2x8x8xf32> to vector<2x8xf32>
    %28 = vector.shape_cast %27 : vector<2x8xf32> to vector<2x8x1xf32>
    %29 = vector.broadcast %28 : vector<2x8x1xf32> to vector<2x8x8xf32>
    %30 = arith.subf %26, %29 : vector<2x8x8xf32>
    %31 = math.exp %30 : vector<2x8x8xf32>
    %cst_13 = arith.constant dense<0.000000e+00> : vector<2x8xf32>
    %32 = vector.multi_reduction <add>, %31, %cst_13 [2] : vector<2x8x8xf32> to vector<2x8xf32>
    %33 = vector.shape_cast %32 : vector<2x8xf32> to vector<2x8x1xf32>
    %34 = tpu.reciprocal %33 {approx = true} : vector<2x8x1xf32> -> vector<2x8x1xf32>
    %35 = vector.broadcast %34 : vector<2x8x1xf32> to vector<2x8x8xf32>
    %36 = arith.mulf %31, %35 : vector<2x8x8xf32>
    "tpu.trace_start"() <{level = 10 : i32, message = "bqk,bkd->bqd"}> : () -> ()
    %cst_14 = arith.constant dense<0.000000e+00> : vector<2x8x8xf32>
    %37 = tpu.matmul %36, %21, %cst_14 {dimension_numbers = #tpu.dot_dimension_numbers<[2], [1], [1], [2], [0, 0, 0, 1, 1, 2], [0], [0]>} : vector<2x8x8xf32>, vector<2x8x8xf32>, vector<2x8x8xf32> -> vector<2x8x8xf32>
    "tpu.trace_stop"() : () -> ()
    %38 = vector.extract_strided_slice %12 {offsets = [0, 0, 8], sizes = [2, 8, 8], strides = [1, 1, 1]} : vector<2x8x32xf32> to vector<2x8x8xf32>
    %39 = vector.extract_strided_slice %14 {offsets = [0, 0, 8], sizes = [2, 8, 8], strides = [1, 1, 1]} : vector<2x8x32xf32> to vector<2x8x8xf32>
    %40 = vector.extract_strided_slice %16 {offsets = [0, 0, 8], sizes = [2, 8, 8], strides = [1, 1, 1]} : vector<2x8x32xf32> to vector<2x8x8xf32>
    "tpu.trace_start"() <{level = 10 : i32, message = "bqd,bkd->bqk"}> : () -> ()
    %cst_15 = arith.constant dense<0.000000e+00> : vector<2x8x8xf32>
    %41 = tpu.matmul %38, %39, %cst_15 {dimension_numbers = #tpu.dot_dimension_numbers<[2], [2], [1], [1], [0, 0, 0, 1, 1, 1], [0], [0]>} : vector<2x8x8xf32>, vector<2x8x8xf32>, vector<2x8x8xf32> -> vector<2x8x8xf32>
    "tpu.trace_stop"() : () -> ()
    %cst_16 = arith.constant 0.353553385 : f32
    %42 = vector.broadcast %cst_16 : f32 to vector<2x8x8xf32>
    %43 = arith.mulf %41, %42 : vector<2x8x8xf32>
    %44 = vector.broadcast %18 : vector<2x1x8xf32> to vector<2x8x8xf32>
    %45 = arith.addf %43, %44 : vector<2x8x8xf32>
    %cst_17 = arith.constant dense<0xFF800000> : vector<2x8xf32>
    %46 = vector.multi_reduction <maximumf>, %45, %cst_17 [2] : vector<2x8x8xf32> to vector<2x8xf32>
    %47 = vector.shape_cast %46 : vector<2x8xf32> to vector<2x8x1xf32>
    %48 = vector.broadcast %47 : vector<2x8x1xf32> to vector<2x8x8xf32>
    %49 = arith.subf %45, %48 : vector<2x8x8xf32>
    %50 = math.exp %49 : vector<2x8x8xf32>
    %cst_18 = arith.constant dense<0.000000e+00> : vector<2x8xf32>
    %51 = vector.multi_reduction <add>, %50, %cst_18 [2] : vector<2x8x8xf32> to vector<2x8xf32>
    %52 = vector.shape_cast %51 : vector<2x8xf32> to vector<2x8x1xf32>
    %53 = tpu.reciprocal %52 {approx = true} : vector<2x8x1xf32> -> vector<2x8x1xf32>
    %54 = vector.broadcast %53 : vector<2x8x1xf32> to vector<2x8x8xf32>
    %55 = arith.mulf %50, %54 : vector<2x8x8xf32>
    "tpu.trace_start"() <{level = 10 : i32, message = "bqk,bkd->bqd"}> : () -> ()
    %cst_19 = arith.constant dense<0.000000e+00> : vector<2x8x8xf32>
    %56 = tpu.matmul %55, %40, %cst_19 {dimension_numbers = #tpu.dot_dimension_numbers<[2], [1], [1], [2], [0, 0, 0, 1, 1, 2], [0], [0]>} : vector<2x8x8xf32>, vector<2x8x8xf32>, vector<2x8x8xf32> -> vector<2x8x8xf32>
    "tpu.trace_stop"() : () -> ()
    %57 = vector.extract_strided_slice %12 {offsets = [0, 0, 16], sizes = [2, 8, 8], strides = [1, 1, 1]} : vector<2x8x32xf32> to vector<2x8x8xf32>
    %58 = vector.extract_strided_slice %14 {offsets = [0, 0, 16], sizes = [2, 8, 8], strides = [1, 1, 1]} : vector<2x8x32xf32> to vector<2x8x8xf32>
    %59 = vector.extract_strided_slice %16 {offsets = [0, 0, 16], sizes = [2, 8, 8], strides = [1, 1, 1]} : vector<2x8x32xf32> to vector<2x8x8xf32>
    "tpu.trace_start"() <{level = 10 : i32, message = "bqd,bkd->bqk"}> : () -> ()
    %cst_20 = arith.constant dense<0.000000e+00> : vector<2x8x8xf32>
    %60 = tpu.matmul %57, %58, %cst_20 {dimension_numbers = #tpu.dot_dimension_numbers<[2], [2], [1], [1], [0, 0, 0, 1, 1, 1], [0], [0]>} : vector<2x8x8xf32>, vector<2x8x8xf32>, vector<2x8x8xf32> -> vector<2x8x8xf32>
    "tpu.trace_stop"() : () -> ()
    %cst_21 = arith.constant 0.353553385 : f32
    %61 = vector.broadcast %cst_21 : f32 to vector<2x8x8xf32>
    %62 = arith.mulf %60, %61 : vector<2x8x8xf32>
    %63 = vector.broadcast %18 : vector<2x1x8xf32> to vector<2x8x8xf32>
    %64 = arith.addf %62, %63 : vector<2x8x8xf32>
    %cst_22 = arith.constant dense<0xFF800000> : vector<2x8xf32>
    %65 = vector.multi_reduction <maximumf>, %64, %cst_22 [2] : vector<2x8x8xf32> to vector<2x8xf32>
    %66 = vector.shape_cast %65 : vector<2x8xf32> to vector<2x8x1xf32>
    %67 = vector.broadcast %66 : vector<2x8x1xf32> to vector<2x8x8xf32>
    %68 = arith.subf %64, %67 : vector<2x8x8xf32>
    %69 = math.exp %68 : vector<2x8x8xf32>
    %cst_23 = arith.constant dense<0.000000e+00> : vector<2x8xf32>
    %70 = vector.multi_reduction <add>, %69, %cst_23 [2] : vector<2x8x8xf32> to vector<2x8xf32>
    %71 = vector.shape_cast %70 : vector<2x8xf32> to vector<2x8x1xf32>
    %72 = tpu.reciprocal %71 {approx = true} : vector<2x8x1xf32> -> vector<2x8x1xf32>
    %73 = vector.broadcast %72 : vector<2x8x1xf32> to vector<2x8x8xf32>
    %74 = arith.mulf %69, %73 : vector<2x8x8xf32>
    "tpu.trace_start"() <{level = 10 : i32, message = "bqk,bkd->bqd"}> : () -> ()
    %cst_24 = arith.constant dense<0.000000e+00> : vector<2x8x8xf32>
    %75 = tpu.matmul %74, %59, %cst_24 {dimension_numbers = #tpu.dot_dimension_numbers<[2], [1], [1], [2], [0, 0, 0, 1, 1, 2], [0], [0]>} : vector<2x8x8xf32>, vector<2x8x8xf32>, vector<2x8x8xf32> -> vector<2x8x8xf32>
    "tpu.trace_stop"() : () -> ()
    %76 = vector.extract_strided_slice %12 {offsets = [0, 0, 24], sizes = [2, 8, 8], strides = [1, 1, 1]} : vector<2x8x32xf32> to vector<2x8x8xf32>
    %77 = vector.extract_strided_slice %14 {offsets = [0, 0, 24], sizes = [2, 8, 8], strides = [1, 1, 1]} : vector<2x8x32xf32> to vector<2x8x8xf32>
    %78 = vector.extract_strided_slice %16 {offsets = [0, 0, 24], sizes = [2, 8, 8], strides = [1, 1, 1]} : vector<2x8x32xf32> to vector<2x8x8xf32>
    "tpu.trace_start"() <{level = 10 : i32, message = "bqd,bkd->bqk"}> : () -> ()
    %cst_25 = arith.constant dense<0.000000e+00> : vector<2x8x8xf32>
    %79 = tpu.matmul %76, %77, %cst_25 {dimension_numbers = #tpu.dot_dimension_numbers<[2], [2], [1], [1], [0, 0, 0, 1, 1, 1], [0], [0]>} : vector<2x8x8xf32>, vector<2x8x8xf32>, vector<2x8x8xf32> -> vector<2x8x8xf32>
    "tpu.trace_stop"() : () -> ()
    %cst_26 = arith.constant 0.353553385 : f32
    %80 = vector.broadcast %cst_26 : f32 to vector<2x8x8xf32>
    %81 = arith.mulf %79, %80 : vector<2x8x8xf32>
    %82 = vector.broadcast %18 : vector<2x1x8xf32> to vector<2x8x8xf32>
    %83 = arith.addf %81, %82 : vector<2x8x8xf32>
    %cst_27 = arith.constant dense<0xFF800000> : vector<2x8xf32>
    %84 = vector.multi_reduction <maximumf>, %83, %cst_27 [2] : vector<2x8x8xf32> to vector<2x8xf32>
    %85 = vector.shape_cast %84 : vector<2x8xf32> to vector<2x8x1xf32>
    %86 = vector.broadcast %85 : vector<2x8x1xf32> to vector<2x8x8xf32>
    %87 = arith.subf %83, %86 : vector<2x8x8xf32>
    %88 = math.exp %87 : vector<2x8x8xf32>
    %cst_28 = arith.constant dense<0.000000e+00> : vector<2x8xf32>
    %89 = vector.multi_reduction <add>, %88, %cst_28 [2] : vector<2x8x8xf32> to vector<2x8xf32>
    %90 = vector.shape_cast %89 : vector<2x8xf32> to vector<2x8x1xf32>
    %91 = tpu.reciprocal %90 {approx = true} : vector<2x8x1xf32> -> vector<2x8x1xf32>
    %92 = vector.broadcast %91 : vector<2x8x1xf32> to vector<2x8x8xf32>
    %93 = arith.mulf %88, %92 : vector<2x8x8xf32>
    "tpu.trace_start"() <{level = 10 : i32, message = "bqk,bkd->bqd"}> : () -> ()
    %cst_29 = arith.constant dense<0.000000e+00> : vector<2x8x8xf32>
    %94 = tpu.matmul %93, %78, %cst_29 {dimension_numbers = #tpu.dot_dimension_numbers<[2], [1], [1], [2], [0, 0, 0, 1, 1, 2], [0], [0]>} : vector<2x8x8xf32>, vector<2x8x8xf32>, vector<2x8x8xf32> -> vector<2x8x8xf32>
    "tpu.trace_stop"() : () -> ()
    %95 = tpu.concatenate %37, %56, %75, %94 in 2 : vector<2x8x8xf32>, vector<2x8x8xf32>, vector<2x8x8xf32>, vector<2x8x8xf32> -> vector<2x8x32xf32>
    %96 = vector.shape_cast %95 : vector<2x8x32xf32> to vector<16x32xf32>
    %c0_30 = arith.constant 0 : index
    %c0_31 = arith.constant 0 : index
    %c0_32 = arith.constant 0 : index
    %97 = vector.load %arg10[%c0_30, %c0_31, %c0_32] : memref<1x32x32xf32, #tpu.memory_space<vmem>>, vector<1x32x32xf32>
    %98 = vector.shape_cast %97 : vector<1x32x32xf32> to vector<32x32xf32>
    %cst_33 = arith.constant dense<0.000000e+00> : vector<16x32xf32>
    %99 = tpu.matmul %96, %98, %cst_33 {dimension_numbers = #tpu.dot_dimension_numbers<[1], [0], [0], [1], [0, 0, 1, 1], [], []>} : vector<16x32xf32>, vector<32x32xf32>, vector<16x32xf32> -> vector<16x32xf32>
    %c0_34 = arith.constant 0 : index
    %c0_35 = arith.constant 0 : index
    %c0_36 = arith.constant 0 : index
    %100 = vector.load %arg11[%c0_34, %c0_35, %c0_36] : memref<1x1x32xf32, #tpu.memory_space<vmem>>, vector<1x1x32xf32>
    %101 = vector.shape_cast %100 : vector<1x1x32xf32> to vector<1x32xf32>
    %102 = vector.broadcast %101 : vector<1x32xf32> to vector<16x32xf32>
    %103 = arith.addf %99, %102 : vector<16x32xf32>
    %104 = arith.addf %103, %3 : vector<16x32xf32>
    %c0_37 = arith.constant 0 : index
    %c0_38 = arith.constant 0 : index
    %c0_39 = arith.constant 0 : index
    %105 = vector.load %arg12[%c0_37, %c0_38, %c0_39] : memref<1x1x32xf32, #tpu.memory_space<vmem>>, vector<1x1x32xf32>
    %106 = vector.shape_cast %105 : vector<1x1x32xf32> to vector<1x32xf32>
    %c0_40 = arith.constant 0 : index
    %c0_41 = arith.constant 0 : index
    %c0_42 = arith.constant 0 : index
    %107 = vector.load %arg13[%c0_40, %c0_41, %c0_42] : memref<1x1x32xf32, #tpu.memory_space<vmem>>, vector<1x1x32xf32>
    %108 = vector.shape_cast %107 : vector<1x1x32xf32> to vector<1x32xf32>
    %cst_43 = arith.constant dense<0.000000e+00> : vector<16xf32>
    %109 = vector.multi_reduction <add>, %104, %cst_43 [1] : vector<16x32xf32> to vector<16xf32>
    %110 = vector.shape_cast %109 : vector<16xf32> to vector<16x1xf32>
    %cst_44 = arith.constant 3.200000e+01 : f32
    %111 = vector.broadcast %cst_44 : f32 to vector<16x1xf32>
    %112 = arith.divf %110, %111 : vector<16x1xf32>
    %113 = vector.broadcast %112 : vector<16x1xf32> to vector<16x32xf32>
    %114 = arith.subf %104, %113 : vector<16x32xf32>
    %115 = arith.mulf %114, %114 : vector<16x32xf32>
    %cst_45 = arith.constant dense<0.000000e+00> : vector<16xf32>
    %116 = vector.multi_reduction <add>, %115, %cst_45 [1] : vector<16x32xf32> to vector<16xf32>
    %117 = vector.shape_cast %116 : vector<16xf32> to vector<16x1xf32>
    %cst_46 = arith.constant 3.200000e+01 : f32
    %118 = vector.broadcast %cst_46 : f32 to vector<16x1xf32>
    %119 = arith.divf %117, %118 : vector<16x1xf32>
    %cst_47 = arith.constant 9.99999996E-13 : f32
    %120 = vector.broadcast %cst_47 : f32 to vector<16x1xf32>
    %121 = arith.addf %119, %120 : vector<16x1xf32>
    %122 = math.rsqrt %121 : vector<16x1xf32>
    %123 = vector.broadcast %122 : vector<16x1xf32> to vector<16x32xf32>
    %124 = arith.mulf %114, %123 : vector<16x32xf32>
    %125 = vector.broadcast %106 : vector<1x32xf32> to vector<16x32xf32>
    %126 = arith.mulf %124, %125 : vector<16x32xf32>
    %127 = vector.broadcast %108 : vector<1x32xf32> to vector<16x32xf32>
    %128 = arith.addf %126, %127 : vector<16x32xf32>
    %c0_48 = arith.constant 0 : index
    %c0_49 = arith.constant 0 : index
    %c0_50 = arith.constant 0 : index
    %129 = vector.load %arg14[%c0_48, %c0_49, %c0_50] : memref<1x32x128xf32, #tpu.memory_space<vmem>>, vector<1x32x128xf32>
    %130 = vector.shape_cast %129 : vector<1x32x128xf32> to vector<32x128xf32>
    %cst_51 = arith.constant dense<0.000000e+00> : vector<16x128xf32>
    %131 = tpu.matmul %128, %130, %cst_51 {dimension_numbers = #tpu.dot_dimension_numbers<[1], [0], [0], [1], [0, 0, 1, 1], [], []>} : vector<16x32xf32>, vector<32x128xf32>, vector<16x128xf32> -> vector<16x128xf32>
    %c0_52 = arith.constant 0 : index
    %c0_53 = arith.constant 0 : index
    %c0_54 = arith.constant 0 : index
    %132 = vector.load %arg15[%c0_52, %c0_53, %c0_54] : memref<1x1x128xf32, #tpu.memory_space<vmem>>, vector<1x1x128xf32>
    %133 = vector.shape_cast %132 : vector<1x1x128xf32> to vector<1x128xf32>
    %134 = vector.broadcast %133 : vector<1x128xf32> to vector<16x128xf32>
    %135 = arith.addf %131, %134 : vector<16x128xf32>
    %cst_55 = arith.constant 5.000000e-01 : f32
    %136 = vector.broadcast %cst_55 : f32 to vector<16x128xf32>
    %137 = arith.mulf %136, %135 : vector<16x128xf32>
    %cst_56 = arith.constant 4.471500e-02 : f32
    %138 = vector.broadcast %cst_56 : f32 to vector<16x128xf32>
    %139 = arith.mulf %138, %135 : vector<16x128xf32>
    %140 = arith.mulf %139, %135 : vector<16x128xf32>
    %141 = arith.mulf %140, %135 : vector<16x128xf32>
    %142 = arith.addf %135, %141 : vector<16x128xf32>
    %cst_57 = arith.constant 0.797884583 : f32
    %143 = vector.broadcast %cst_57 : f32 to vector<16x128xf32>
    %144 = arith.mulf %143, %142 : vector<16x128xf32>
    %145 = math.tanh %144 : vector<16x128xf32>
    %cst_58 = arith.constant 1.000000e+00 : f32
    %146 = vector.broadcast %cst_58 : f32 to vector<16x128xf32>
    %147 = arith.addf %146, %145 : vector<16x128xf32>
    %148 = arith.mulf %137, %147 : vector<16x128xf32>
    %c0_59 = arith.constant 0 : index
    %c0_60 = arith.constant 0 : index
    %c0_61 = arith.constant 0 : index
    %149 = vector.load %arg16[%c0_59, %c0_60, %c0_61] : memref<1x128x32xf32, #tpu.memory_space<vmem>>, vector<1x128x32xf32>
    %150 = vector.shape_cast %149 : vector<1x128x32xf32> to vector<128x32xf32>
    %cst_62 = arith.constant dense<0.000000e+00> : vector<16x32xf32>
    %151 = tpu.matmul %148, %150, %cst_62 {dimension_numbers = #tpu.dot_dimension_numbers<[1], [0], [0], [1], [0, 0, 1, 1], [], []>} : vector<16x128xf32>, vector<128x32xf32>, vector<16x32xf32> -> vector<16x32xf32>
    %c0_63 = arith.constant 0 : index
    %c0_64 = arith.constant 0 : index
    %c0_65 = arith.constant 0 : index
    %152 = vector.load %arg17[%c0_63, %c0_64, %c0_65] : memref<1x1x32xf32, #tpu.memory_space<vmem>>, vector<1x1x32xf32>
    %153 = vector.shape_cast %152 : vector<1x1x32xf32> to vector<1x32xf32>
    %154 = vector.broadcast %153 : vector<1x32xf32> to vector<16x32xf32>
    %155 = arith.addf %151, %154 : vector<16x32xf32>
    %156 = arith.addf %155, %128 : vector<16x32xf32>
    %c0_66 = arith.constant 0 : index
    %c0_67 = arith.constant 0 : index
    %c0_68 = arith.constant 0 : index
    %157 = vector.load %arg18[%c0_66, %c0_67, %c0_68] : memref<1x1x32xf32, #tpu.memory_space<vmem>>, vector<1x1x32xf32>
    %158 = vector.shape_cast %157 : vector<1x1x32xf32> to vector<1x32xf32>
    %c0_69 = arith.constant 0 : index
    %c0_70 = arith.constant 0 : index
    %c0_71 = arith.constant 0 : index
    %159 = vector.load %arg19[%c0_69, %c0_70, %c0_71] : memref<1x1x32xf32, #tpu.memory_space<vmem>>, vector<1x1x32xf32>
    %160 = vector.shape_cast %159 : vector<1x1x32xf32> to vector<1x32xf32>
    %cst_72 = arith.constant dense<0.000000e+00> : vector<16xf32>
    %161 = vector.multi_reduction <add>, %156, %cst_72 [1] : vector<16x32xf32> to vector<16xf32>
    %162 = vector.shape_cast %161 : vector<16xf32> to vector<16x1xf32>
    %cst_73 = arith.constant 3.200000e+01 : f32
    %163 = vector.broadcast %cst_73 : f32 to vector<16x1xf32>
    %164 = arith.divf %162, %163 : vector<16x1xf32>
    %165 = vector.broadcast %164 : vector<16x1xf32> to vector<16x32xf32>
    %166 = arith.subf %156, %165 : vector<16x32xf32>
    %167 = arith.mulf %166, %166 : vector<16x32xf32>
    %cst_74 = arith.constant dense<0.000000e+00> : vector<16xf32>
    %168 = vector.multi_reduction <add>, %167, %cst_74 [1] : vector<16x32xf32> to vector<16xf32>
    %169 = vector.shape_cast %168 : vector<16xf32> to vector<16x1xf32>
    %cst_75 = arith.constant 3.200000e+01 : f32
    %170 = vector.broadcast %cst_75 : f32 to vector<16x1xf32>
    %171 = arith.divf %169, %170 : vector<16x1xf32>
    %cst_76 = arith.constant 9.99999996E-13 : f32
    %172 = vector.broadcast %cst_76 : f32 to vector<16x1xf32>
    %173 = arith.addf %171, %172 : vector<16x1xf32>
    %174 = math.rsqrt %173 : vector<16x1xf32>
    %175 = vector.broadcast %174 : vector<16x1xf32> to vector<16x32xf32>
    %176 = arith.mulf %166, %175 : vector<16x32xf32>
    %177 = vector.broadcast %158 : vector<1x32xf32> to vector<16x32xf32>
    %178 = arith.mulf %176, %177 : vector<16x32xf32>
    %179 = vector.broadcast %160 : vector<1x32xf32> to vector<16x32xf32>
    %180 = arith.addf %178, %179 : vector<16x32xf32>
    %c0_77 = arith.constant 0 : index
    %c0_78 = arith.constant 0 : index
    %181 = vector.load %arg21[%c0_77, %c0_78] : memref<16x32xf32, #tpu.memory_space<vmem>>, vector<16x32xf32>
    tpu.vector_store %arg21[%c0_77, %c0_78], %180 {strides = array<i32>} : memref<16x32xf32, #tpu.memory_space<vmem>>, vector<16x32xf32>,
    %c1_i32 = arith.constant 1 : i32
    %182 = arith.cmpi eq, %arg0, %c1_i32 : i32
    %183 = arith.extui %182 : i1 to i32
    %c0_i32_79 = arith.constant 0 : i32
    %184 = arith.cmpi ne, %183, %c0_i32_79 : i32
    scf.if %184 {
      %185 = vector.extract_strided_slice %180 {offsets = [0, 0], sizes = [1, 32], strides = [1, 1]} : vector<16x32xf32> to vector<1x32xf32>
      %186 = vector.extract_strided_slice %180 {offsets = [8, 0], sizes = [1, 32], strides = [1, 1]} : vector<16x32xf32> to vector<1x32xf32>
      %187 = tpu.concatenate %185, %186 in 0 : vector<1x32xf32>, vector<1x32xf32> -> vector<2x32xf32>
      %c0_80 = arith.constant 0 : index
      %c0_81 = arith.constant 0 : index
      %188 = vector.load %arg5[%c0_80, %c0_81] : memref<32x32xf32, #tpu.memory_space<vmem>>, vector<32x32xf32>
      %cst_82 = arith.constant dense<0.000000e+00> : vector<2x32xf32>
      %189 = tpu.matmul %187, %188, %cst_82 {dimension_numbers = #tpu.dot_dimension_numbers<[1], [0], [0], [1], [0, 0, 1, 1], [], []>} : vector<2x32xf32>, vector<32x32xf32>, vector<2x32xf32> -> vector<2x32xf32>
      %c0_83 = arith.constant 0 : index
      %c0_84 = arith.constant 0 : index
      %190 = vector.load %arg6[%c0_83, %c0_84] : memref<1x32xf32, #tpu.memory_space<vmem>>, vector<1x32xf32>
      %191 = vector.broadcast %190 : vector<1x32xf32> to vector<2x32xf32>
      %192 = arith.addf %189, %191 : vector<2x32xf32>
      %193 = math.tanh %192 : vector<2x32xf32>
      %c0_85 = arith.constant 0 : index
      %c0_86 = arith.constant 0 : index
      %194 = vector.load %arg7[%c0_85, %c0_86] : memref<32x1xf32, #tpu.memory_space<vmem>>, vector<32x1xf32>
      %cst_87 = arith.constant dense<0.000000e+00> : vector<2x1xf32>
      %195 = tpu.matmul %193, %194, %cst_87 {dimension_numbers = #tpu.dot_dimension_numbers<[1], [0], [0], [1], [0, 0, 1, 1], [], []>} : vector<2x32xf32>, vector<32x1xf32>, vector<2x1xf32> -> vector<2x1xf32>
      %cst_88 = arith.constant 0.000000e+00 : f32
      %196 = vector.broadcast %cst_88 : f32 to vector<2x1xf32>
      %197 = arith.subf %196, %195 : vector<2x1xf32>
      %198 = math.exp %197 : vector<2x1xf32>
      %cst_89 = arith.constant 1.000000e+00 : f32
      %199 = vector.broadcast %cst_89 : f32 to vector<2x1xf32>
      %200 = arith.addf %199, %198 : vector<2x1xf32>
      %cst_90 = arith.constant 1.000000e+00 : f32
      %201 = vector.broadcast %cst_90 : f32 to vector<2x1xf32>
      %202 = arith.divf %201, %200 : vector<2x1xf32>
      %c0_91 = arith.constant 0 : index
      %c0_92 = arith.constant 0 : index
      %203 = vector.load %arg20[%c0_91, %c0_92] : memref<2x1xf32, #tpu.memory_space<vmem>>, vector<2x1xf32>
      tpu.vector_store %arg20[%c0_91, %c0_92], %202 {strides = array<i32>} : memref<2x1xf32, #tpu.memory_space<vmem>>, vector<2x1xf32>,
    } else {
    }
    return
  }
  func.func @transform_0(%arg0: i32) -> (i32, i32) {
    %c0_i32 = arith.constant 0 : i32
    %c0_i32_0 = arith.constant 0 : i32
    %c0_i32_1 = arith.constant 0 : i32
    return %c0_i32, %c0_i32_0 : i32, i32
  }
  func.func @transform_1(%arg0: i32) -> (i32, i32) {
    %c0_i32 = arith.constant 0 : i32
    %c0_i32_0 = arith.constant 0 : i32
    %c0_i32_1 = arith.constant 0 : i32
    return %c0_i32, %c0_i32_0 : i32, i32
  }
  func.func @transform_2(%arg0: i32) -> (i32, i32) {
    %c0_i32 = arith.constant 0 : i32
    %c0_i32_0 = arith.constant 0 : i32
    %c0_i32_1 = arith.constant 0 : i32
    return %c0_i32, %c0_i32_0 : i32, i32
  }
  func.func @transform_3(%arg0: i32) -> (i32, i32) {
    %c0_i32 = arith.constant 0 : i32
    %c0_i32_0 = arith.constant 0 : i32
    %c0_i32_1 = arith.constant 0 : i32
    return %c0_i32, %c0_i32_0 : i32, i32
  }
  func.func @transform_4(%arg0: i32) -> (i32, i32) {
    %c0_i32 = arith.constant 0 : i32
    %c0_i32_0 = arith.constant 0 : i32
    %c0_i32_1 = arith.constant 0 : i32
    return %c0_i32, %c0_i32_0 : i32, i32
  }
  func.func @transform_5(%arg0: i32) -> (i32, i32) {
    %c0_i32 = arith.constant 0 : i32
    %c0_i32_0 = arith.constant 0 : i32
    %c0_i32_1 = arith.constant 0 : i32
    return %c0_i32, %c0_i32_0 : i32, i32
  }
  func.func @transform_6(%arg0: i32) -> (i32, i32) {
    %c0_i32 = arith.constant 0 : i32
    %c0_i32_0 = arith.constant 0 : i32
    %c0_i32_1 = arith.constant 0 : i32
    return %c0_i32, %c0_i32_0 : i32, i32
  }
  func.func @transform_7(%arg0: i32) -> (i32, i32, i32) {
    %c0_i32 = arith.constant 0 : i32
    %c0_i32_0 = arith.constant 0 : i32
    %c0_i32_1 = arith.constant 0 : i32
    return %arg0, %c0_i32, %c0_i32_0 : i32, i32, i32
  }
  func.func @transform_8(%arg0: i32) -> (i32, i32, i32) {
    %c0_i32 = arith.constant 0 : i32
    %c0_i32_0 = arith.constant 0 : i32
    %c0_i32_1 = arith.constant 0 : i32
    return %arg0, %c0_i32, %c0_i32_0 : i32, i32, i32
  }
  func.func @transform_9(%arg0: i32) -> (i32, i32, i32) {
    %c0_i32 = arith.constant 0 : i32
    %c0_i32_0 = arith.constant 0 : i32
    %c0_i32_1 = arith.constant 0 : i32
    return %arg0, %c0_i32, %c0_i32_0 : i32, i32, i32
  }
  func.func @transform_10(%arg0: i32) -> (i32, i32, i32) {
    %c0_i32 = arith.constant 0 : i32
    %c0_i32_0 = arith.constant 0 : i32
    %c0_i32_1 = arith.constant 0 : i32
    return %arg0, %c0_i32, %c0_i32_0 : i32, i32, i32
  }
  func.func @transform_11(%arg0: i32) -> (i32, i32, i32) {
    %c0_i32 = arith.constant 0 : i32
    %c0_i32_0 = arith.constant 0 : i32
    %c0_i32_1 = arith.constant 0 : i32
    return %arg0, %c0_i32, %c0_i32_0 : i32, i32, i32
  }
  func.func @transform_12(%arg0: i32) -> (i32, i32, i32) {
    %c0_i32 = arith.constant 0 : i32
    %c0_i32_0 = arith.constant 0 : i32
    %c0_i32_1 = arith.constant 0 : i32
    return %arg0, %c0_i32, %c0_i32_0 : i32, i32, i32
  }
  func.func @transform_13(%arg0: i32) -> (i32, i32, i32) {
    %c0_i32 = arith.constant 0 : i32
    %c0_i32_0 = arith.constant 0 : i32
    %c0_i32_1 = arith.constant 0 : i32
    return %arg0, %c0_i32, %c0_i32_0 : i32, i32, i32
  }
  func.func @transform_14(%arg0: i32) -> (i32, i32, i32) {
    %c0_i32 = arith.constant 0 : i32
    %c0_i32_0 = arith.constant 0 : i32
    %c0_i32_1 = arith.constant 0 : i32
    return %arg0, %c0_i32, %c0_i32_0 : i32, i32, i32
  }
  func.func @transform_15(%arg0: i32) -> (i32, i32, i32) {
    %c0_i32 = arith.constant 0 : i32
    %c0_i32_0 = arith.constant 0 : i32
    %c0_i32_1 = arith.constant 0 : i32
    return %arg0, %c0_i32, %c0_i32_0 : i32, i32, i32
  }
  func.func @transform_16(%arg0: i32) -> (i32, i32, i32) {
    %c0_i32 = arith.constant 0 : i32
    %c0_i32_0 = arith.constant 0 : i32
    %c0_i32_1 = arith.constant 0 : i32
    return %arg0, %c0_i32, %c0_i32_0 : i32, i32, i32
  }
  func.func @transform_17(%arg0: i32) -> (i32, i32, i32) {
    %c0_i32 = arith.constant 0 : i32
    %c0_i32_0 = arith.constant 0 : i32
    %c0_i32_1 = arith.constant 0 : i32
    return %arg0, %c0_i32, %c0_i32_0 : i32, i32, i32
  }
  func.func @transform_18(%arg0: i32) -> (i32, i32, i32) {
    %c0_i32 = arith.constant 0 : i32
    %c0_i32_0 = arith.constant 0 : i32
    %c0_i32_1 = arith.constant 0 : i32
    return %arg0, %c0_i32, %c0_i32_0 : i32, i32, i32
  }
  func.func @transform_19(%arg0: i32) -> (i32, i32) {
    %c0_i32 = arith.constant 0 : i32
    %c0_i32_0 = arith.constant 0 : i32
    %c0_i32_1 = arith.constant 0 : i32
    return %c0_i32, %c0_i32_0 : i32, i32
  }
}

</mosaic_0001>

<bundles_post_ra>
// kernel: my_model_forward.1
= control target key start
LH: loop header
LB: loop body
LE: loop exit
PB: predicated region body
PF: predicated region fallthrough
CT: control target
= control target key end

     0   :  { %s3908_s0 = inlined_call_operand.vmem [shape: f32[16,32], index: 0, kind: input, shape index: {}]   ;;  %s3909_s1 = inlined_call_operand.vmem [shape: f32[2,8], index: 1, kind: input, shape index: {}]   ;;  %s3910_s2 = inlined_call_operand.vmem [shape: f32[1,32], index: 2, kind: input, shape index: {}]   ;;  %s3911_s3 = inlined_call_operand.vmem [shape: f32[1,32], index: 3, kind: input, shape index: {}]   ;;  %s3912_s4 = inlined_call_operand.vmem [shape: f32[32,32], index: 4, kind: input, shape index: {}]   ;;  %s3913_s5 = inlined_call_operand.vmem [shape: f32[1,32], index: 5, kind: input, shape index: {}]   ;;  %s3914_s6 = inlined_call_operand.vmem [shape: f32[32,1], index: 6, kind: input, shape index: {}]   ;;  %s3915_s7 = inlined_call_operand.vmem [shape: f32[2,32,96], index: 7, kind: input, shape index: {}]   ;;  %s3916_s8 = inlined_call_operand.vmem [shape: f32[2,1,96], index: 8, kind: input, shape index: {}]   ;;  %s3917_s9 = inlined_call_operand.vmem [shape: f32[2,32,32], index: 9, kind: input, shape index: {}]   ;;  %s3918_s10 = inlined_call_operand.vmem [shape: f32[2,1,32], index: 10, kind: input, shape index: {}]   ;;  %s3919_s11 = inlined_call_operand.vmem [shape: f32[2,1,32], index: 11, kind: input, shape index: {}]   ;;  %s3920_s12 = inlined_call_operand.vmem [shape: f32[2,1,32], index: 12, kind: input, shape index: {}]   ;;  %s3921_s13 = inlined_call_operand.vmem [shape: f32[2,32,128], index: 13, kind: input, shape index: {}]   ;;  %s3922_s14 = inlined_call_operand.vmem [shape: f32[2,1,128], index: 14, kind: input, shape index: {}]   ;;  %s3923_s15 = inlined_call_operand.vmem [shape: f32[2,128,32], index: 15, kind: input, shape index: {}]   ;;  %s3924_s16 = inlined_call_operand.vmem [shape: f32[2,1,32], index: 16, kind: input, shape index: {}]   ;;  %s3925_s17 = inlined_call_operand.vmem [shape: f32[2,1,32], index: 17, kind: input, shape index: {}]   ;;  %s3926_s18 = inlined_call_operand.vmem [shape: f32[2,1,32], index: 18, kind: input, shape index: {}]   ;;  %s3927_s19 = inlined_call_operand.vmem [shape: f32[2,1], index: 19, kind: output, shape index: {}]  }
   0x1   :  { %3932 = sst [smem:[#allocation4_spill]] %s3908_s0  ;;  %s3540_s0 = smov 0  }
   0x2   :  { %3933 = sst [smem:[#allocation5_spill]] %s3909_s1 }
   0x3   :  { %3934 = sst [smem:[#allocation6_spill]] %s3910_s2 }
   0x4   :  { %3935 = sst [smem:[#allocation7_spill]] %s3911_s3 }
   0x5   :  { %3936 = sst [smem:[#allocation8_spill]] %s3912_s4 }
   0x6   :  { %3937 = sst [smem:[#allocation9_spill]] %s3913_s5 }
   0x7   :  { %3938 = sst [smem:[#allocation10_spill]] %s3914_s6 }
   0x8   :  { %3939 = sst [smem:[#allocation11_spill]] %s3915_s7 }
   0x9   :  { %3940 = sst [smem:[#allocation12_spill]] %s3917_s9 }
   0xa   :  { %3941 = sst [smem:[#allocation13_spill]] %s3927_s19 }
   0xb LB: > { %3942 = sst [smem:[#allocation3_spill]] %s3419_s0  ;;  %s3546_s30 = sadd.s32 4294967295, %s3419_s0   ;;  %s3419_s0 = sphi %s3540_s0, %s29_s0  }
   0xc   : > { %p3023_p0 = scmp.ge.s32.totalorder %s3419_s0, 1  ;;  %p626_p1 = scmp.lt.s32.totalorder %s3419_s0, 3 }
   0xe   : > { %p627_p2 = pnand %p3023_p0, %p626_p1 }
   0xf   : > { %p716_p3 = scmp.lt.s32.totalorder (!%p627_p2), %s3546_s30, 1  ;;  %s3943_s7 = sld [smem:[#allocation11_spill]] (!%p627_p2) }
  0x10   : > { %630 = sbr.rel (%p627_p2) target bundleno = 4723 (0x1273), region = 96  ;;  %s3944_s9 = sld [smem:[#allocation12_spill]] (!%p627_p2) }
  0x11   : > { %p3032_p4 = scmp.ne.s32.totalorder (!%p627_p2), %s3546_s30, 0 }
  0x15   : > { %s3552_s20 = scalar_select %p716_p3, %s3546_s30, 1 }
  0x16   : > { %s3945_s28 = sld [smem:[#allocation4_spill]] (!%p3032_p4) }
  0x17   : > { %s3080_s21 = sshll.u32 %s3552_s20, 5  ;;  %s3083_s4 = sshll.u32 %s3552_s20, 7 }
  0x18   : > { %s3562_s25 = scalar_lea.vmem %s3943_s7, %s3080_s21  ;;  %s3567_s27 = scalar_lea.vmem %s3944_s9, %s3080_s21 }
  0x19   : > { %s3584_s7 = scalar_lea.vmem %s3921_s13, %s3080_s21  ;;  %s745_s9 = scalar_lea.vmem %s3922_s14, %s3552_s20 }
  0x1a   : > { %s3594_s0 = scalar_lea.vmem %s3923_s15, %s3083_s4  ;;  %s753_s1 = scalar_lea.vmem %s3924_s16, %s3552_s20 }
  0x1b   : > { %s756_s23 = scalar_lea.vmem %s3925_s17, %s3552_s20  ;;  %s759_s6 = scalar_lea.vmem %s3926_s18, %s3552_s20 }
  0x1c   : > { %763 = sbr.rel (%p3032_p4) target bundleno = 347 (0x15b), region = 100  ;;  %s3946_s19 = sld [smem:[#allocation6_spill]] (!%p3032_p4) }
  0x1d   : > { %s3947_s24 = sld [smem:[#allocation7_spill]] (!%p3032_p4) }
  0x21   : > { %v764_v0 = vld [vmem:[%s3945_s28] sm:$0xff]  ;;  %vm768_vm0 = vcmask 261120   ;;  %v765_v1 = vld [vmem:[%s3945_s28 + $0x8] sm:$0xff] }
  0x22   : > { %v769_v2 = vsel %vm768_vm0, %v764_v0, 0.0  ;;  %v772_v3 = vsel %vm768_vm0, %v765_v1, 0.0  ;;  %v3033_v21 = vld [vmem:[%s3946_s19] ss:$0 sm:$0xff] }
  0x23   : > { %770 = vadd.xlane.f32.xlu0 %v769_v2  ;;  %v3034_v23 = vld [vmem:[%s3947_s24] ss:$0 sm:$0xff] }
  0x27   : > { %773 = vadd.xlane.f32.xlu0 %v772_v3 }
  0xac   : > { %v771_v4 = vpop.xlane.xlu0 %770 }
  0xad   : > { %v776_v5 = vmul.f32 0.03125, %v771_v4 }
  0xaf   : > { %v778_v6 = vsub.f32 %v764_v0, %v776_v5 }
  0xb0   : > { %v774_v7 = vpop.xlane.xlu0 %773 }
  0xb1   : > { %v777_v8 = vmul.f32 0.03125, %v774_v7  ;;  %v780_v9 = vmul.f32 %v778_v6, %v778_v6 }
  0xb3   : > { %v779_v10 = vsub.f32 %v765_v1, %v777_v8  ;;  %v782_v11 = vsel %vm768_vm0, %v780_v9, 0.0 }
  0xb4   : > { %783 = vadd.xlane.f32.xlu1 %v782_v11 }
  0xb5   : > { %v781_v12 = vmul.f32 %v779_v10, %v779_v10 }
  0xb7   : > { %v785_v13 = vsel %vm768_vm0, %v781_v12, 0.0 }
  0xb8   : > { %786 = vadd.xlane.f32.xlu1 %v785_v13 }
 0x13d   : > { %v784_v14 = vpop.xlane.xlu1 %783 }
 0x13e   : > { %v788_v15 = vmul.f32 0.03125, %v784_v14 }
 0x140   : > { %v790_v16 = vadd.f32 1e-12, %v788_v15 }
 0x141   : > { %v787_v17 = vpop.xlane.xlu1 %786 }
 0x142   : > { %3359 = vrsqrt.f32 %v790_v16  ;;  %v789_v18 = vmul.f32 0.03125, %v787_v17 }
 0x144   : > { %v791_v19 = vadd.f32 1e-12, %v789_v18 }
 0x146   : > { %3361 = vrsqrt.f32 %v791_v19 }
 0x14f   : > { %v3360_v20 = vpop.eup %3359 }
 0x150   : > { %v794_v22 = vmul.f32 %v3360_v20, %v778_v6 }
 0x152   : > { %v802_v24 = vmul.f32 %v3033_v21, %v794_v22 }
 0x153   : > { %v3362_v25 = vpop.eup %3361 }
 0x154   : > { %v810_v26 = vadd.f32 %v3034_v23, %v802_v24  ;;  %v795_v27 = vmul.f32 %v3362_v25, %v779_v10 }
 0x156   : > { %812 = vst.msk [vmem:[#allocation2] sm:$0xff] %vm768_vm0, %v810_v26  ;;  %v803_v28 = vmul.f32 %v3033_v21, %v795_v27 }
 0x158   : > { %v811_v29 = vadd.f32 %v3034_v23, %v803_v28 }
 0x15a   : > { %813 = vst.msk [vmem:[#allocation2 + $0x8] sm:$0xff] %vm768_vm0, %v811_v29 }
 0x15b PF: > { %v819_v30 = vld [vmem:[%s3562_s25 + $0x18] sm:$0xff]  ;;  %v818_v31 = vld [vmem:[%s3562_s25 + $0x10] sm:$0xff]  ;;  %vm827_vm1 = vcmask 261120   ;;  %v817_v33 = vld [vmem:[%s3562_s25 + $0x8] sm:$0xff]  ;;  %v3421_v36 = vmov 0.0   ;;  %vm3422_vm2 = vmmov 0   ;;  %s3948_s26 = scalar_lea.vmem %s3916_s8, %s3552_s20  ;;  %v922_v46 = vlaneseq }
 0x15c   : > { %3162 = vmatprep.subr.mxu1 %v819_v30  ;;  %v816_v34 = vld [vmem:[%s3562_s25] sm:$0xff]  ;;  %3183 = vmatprep.subr.mxu0 %v3421_v36  ;;  %s3423_s4 = smov 96   ;;  %vm936_vm3 = vcmask 64512   ;;  %v3424_v44 = vmov 1966171168   ;;  %s3949_s5 = sld [smem:[#allocation5_spill]] }
 0x15d   : > { %v3629_v32 = vld [vmem:[#allocation2] sm:$0xff]  ;;  %3163 = vmatpush3.msra.mxu1 %v819_v30  ;;  %3185 = vmatprep.mubr.msk.f32.mxu0 %vm3422_vm2, %v3421_v36  ;;  %v920_v45 = vunpack.c.l.s4 %v3424_v44  ;;  %v923_v48 = vshrl.u32 %v922_v46, 7  ;;  %s3425_s19 = smov 64   ;;  %s3426_s22 = smov 88   ;;  %vm2307_vm4 = vcmask 195584   ;;  %vm2304_vm5 = vcmask 130048  }
 0x15e   : > { %3170 = vmatprep.mubr.msk.f32.mxu1 %vm827_vm1, %v3629_v32  ;;  %3164 = vmatprep.subr.mxu1 %v818_v31  ;;  %v3035_v38 = vld [vmem:[%s3948_s26] ss:$0 sm:$0xff]  ;;  %s3427_s21 = smov 120   ;;  %s3428_s24 = smov 56  }
 0x15f   : > { %3165 = vmatpush3.msra.mxu1 %v818_v31  ;;  %v921_v47 = vunpack.c.0.s8 %v920_v45  ;;  %v1092_v53 = vsub.s32 0, %v923_v48  ;;  %s3429_s25 = smov 80   ;;  %s3430_s3 = smov 112  }
 0x160   : > { %3166 = vmatprep.subr.mxu1 %v817_v33  ;;  %s3431_s26 = smov 48   ;;  %s3433_s29 = smov 104  }
 0x161   : > { %3167 = vmatpush3.msra.mxu1 %v817_v33  ;;  %v3635_v35 = vld [vmem:[#allocation2 + $0x8] sm:$0xff]  ;;  %v924_v49 = vsub.s32 %v921_v47, %v923_v48  ;;  %s3434_s2 = smov 40   ;;  %p3074_p5 = scmp.ne.s32.totalorder %s3546_s30, 1 }
 0x162   : > { %3168 = vmatprep.subr.mxu1 %v816_v34  ;;  %v3038_v50 = vld.sshfl [vmem:[%s3949_s5] sm:$0x11 pattern:$0x75316420]  ;;  %s3435_s5 = smov 8  }
 0x163   : > { %3169 = vmatpush3.msra.mxu1 %v816_v34  ;;  %v918_v51 = vcombine.high %v3038_v50, %v3038_v50  ;;  %v925_v52 = vrot.slane %v3038_v50, %v924_v49 }
 0x164   : > { %3171 = vmatmul.mubr.msk.f32.vlgmr.msra.gmra.mxu1 %vm827_vm1, %v3635_v35  ;;  %3173 = vmatprep.subr.mxu1 %v3421_v36 }
 0x165   : > { %3175 = vmatprep.mubr.msk.f32.mxu1 %vm3422_vm2, %v3421_v36  ;;  %v3671_v54 = vrot.slane %v925_v52, %v1092_v53  ;;  %v932_v55 = vrot.slane %v918_v51, %v924_v49 }
 0x167   : > { %v3674_v60 = vrot.slane %v932_v55, %v1092_v53 }
 0x224   : > { %v3172_v37 = vpop.f32.mrf.mxu1 }
 0x225   : > { %v3653_v41 = vadd.f32 %v3172_v37, %v3035_v38 }
 0x226   : > { %v900_v39 = vpop.f32.mrf.mxu1 }
 0x227   : > { %v3650_v40 = vadd.f32 %v3035_v38, %v900_v39 }
 0x229   : > { %934 = vrot.lane.b32.xlu0 %v3650_v40, %s3423_s4 }
 0x22d   : > { %1012 = vrot.lane.b32.xlu0 %v3653_v41, %s3423_s4  ;;  %s3432_s4 = smov 72  }
 0x29b   : > { %v935_v42 = vpop.permute.xlu0 %934 }
 0x29c   : > { %3174 = vmatpush3.xpose.msk.msra.mxu1 %vm936_vm3, %v935_v42 }
 0x29d   : > { %3178 = vmatprep.subr.mxu1 %v3421_v36 }
 0x29f   : > { %3176 = vmatmul.mubr.msk.f32.vlgmr.msra.gmra.mxu1 %vm936_vm3, %v3650_v40  ;;  %v1013_v43 = vpop.permute.xlu0 %1012 }
 0x2a0   : > { %3179 = vmatpush3.xpose.msk.msra.mxu1 %vm936_vm3, %v1013_v43  ;;  %3180 = vmatprep.mubr.msk.f32.mxu1 %vm3422_vm2, %v3421_v36 }
 0x2a1   : > { %3188 = vmatprep.subr.mxu1 %v3421_v36 }
 0x2a3   : > { %3181 = vmatmul.mubr.msk.f32.vlgmr.msra.gmra.mxu1 %vm936_vm3, %v3653_v41 }
 0x2a4   : > { %3190 = vmatprep.mubr.msk.f32.mxu1 %vm3422_vm2, %v3421_v36 }
 0x35f   : > { %v1007_v56 = vpop.f32.mrf.mxu1 }
 0x360   : > { %v1088_v57 = vmul.f32 0.35355338, %v1007_v56 }
 0x361   : > { %v3177_v58 = vpop.f32.mrf.mxu1 }
 0x362   : > { %v1100_v59 = vadd.f32 %v3671_v54, %v1088_v57 }
 0x363   : > { %v1084_v61 = vpop.f32.mrf.mxu1 }
 0x364   : > { %v1089_v62 = vmul.f32 0.35355338, %v1084_v61  ;;  %v1102_v63 = vsel %vm936_vm3, %v1100_v59, -inf }
 0x365   : > { %1103 = vmax.xlane.f32.xlu1 %v1102_v63  ;;  %v3182_v0 = vpop.f32.mrf.mxu1 }
 0x366   : > { %v1101_v1 = vadd.f32 %v3674_v60, %v1089_v62 }
 0x368   : > { %v1105_v2 = vsel %vm936_vm3, %v1101_v1, -inf }
 0x369   : > { %1106 = vmax.xlane.f32.xlu1 %v1105_v2 }
 0x37a   : > { %1124 = vrot.lane.b32.xlu1 %v3650_v40, %s3425_s19 }
 0x37e   : > { %1200 = vrot.lane.b32.xlu1 %v3653_v41, %s3425_s19  ;;  %s3436_s19 = smov 16  }
 0x382   : > { %1278 = vrot.lane.b32.xlu1 %v3650_v40, %s3426_s22 }
 0x386   : > { %1356 = vrot.lane.b32.xlu1 %v3653_v41, %s3426_s22  ;;  %s3437_s22 = smov 24  }
 0x3ee   : > { %v1104_v3 = vpop.xlane.xlu1 %1103 }
 0x3ef   : > { %v1108_v4 = vsub.f32 %v1100_v59, %v1104_v3 }
 0x3f1   : > { %v1110_v5 = vmul.f32 1.442695, %v1108_v4 }
 0x3f2   : > { %v1107_v6 = vpop.xlane.xlu1 %1106 }
 0x3f3   : > { %3363 = vpow2.f32 %v1110_v5  ;;  %v1109_v7 = vsub.f32 %v1101_v1, %v1107_v6 }
 0x3f5   : > { %v1112_v8 = vmul.f32 1.442695, %v1109_v7 }
 0x3f6   : > { %v1125_v9 = vpop.permute.xlu1 %1124 }
 0x3f7   : > { %3365 = vpow2.f32 %v1112_v8  ;;  %3184 = vmatpush3.msra.mxu0 %v1125_v9 }
 0x3f8   : > { %3193 = vmatprep.subr.mxu0 %v3421_v36 }
 0x3fa   : > { %v1201_v10 = vpop.permute.xlu1 %1200 }
 0x3fb   : > { %3189 = vmatpush3.msra.mxu1 %v1201_v10 }
 0x3fc   : > { %3198 = vmatprep.subr.mxu1 %v3421_v36 }
 0x3fe   : > { %v1279_v15 = vpop.permute.xlu1 %1278 }
 0x400   : > { %v3364_v11 = vpop.eup %3363 }
 0x401   : > { %v1114_v12 = vsel %vm936_vm3, %v3364_v11, 0.0 }
 0x402   : > { %1115 = vadd.xlane.f32.xlu0 %v1114_v12  ;;  %v1357_v16 = vpop.permute.xlu1 %1356 }
 0x404   : > { %v3366_v13 = vpop.eup %3365 }
 0x405   : > { %v1117_v14 = vsel %vm936_vm3, %v3366_v13, 0.0 }
 0x406   : > { %1118 = vadd.xlane.f32.xlu1 %v1117_v14 }
 0x417   : > { %1354 = vrot.lane.b32.xlu1 %v3653_v41, %s3427_s21 }
 0x418   : > { %1276 = vrot.lane.b32.xlu0 %v3650_v40, %s3427_s21 }
 0x48b   : > { %v1116_v17 = vpop.xlane.xlu0 %1115 }
 0x48c   : > { %3367 = vrcp.f32 %v1116_v17 }
 0x48f   : > { %v1119_v18 = vpop.xlane.xlu1 %1118  ;;  %v1277_v23 = vpop.permute.xlu0 %1276 }
 0x490   : > { %3369 = vrcp.f32 %v1119_v18 }
 0x493   : > { %v1355_v24 = vpop.permute.xlu1 %1354 }
 0x499   : > { %v3368_v19 = vpop.eup %3367 }
 0x49a   : > { %v1122_v20 = vmul.f32 %v3368_v19, %v3364_v11 }
 0x49c   : > { %3186 = vmatmul.mubr.msk.f32.vlgmr.msra.gmra.mxu0 %vm936_vm3, %v1122_v20 }
 0x49d   : > { %v3370_v21 = vpop.eup %3369  ;;  %3194 = vmatpush3.xpose.msk.msra.mxu0 %vm936_vm3, %v1279_v15  ;;  %3195 = vmatprep.mubr.msk.f32.mxu0 %vm3422_vm2, %v3421_v36 }
 0x49e   : > { %v1123_v22 = vmul.f32 %v3370_v21, %v3366_v13  ;;  %3203 = vmatprep.subr.mxu0 %v3421_v36 }
 0x4a0   : > { %3191 = vmatmul.mubr.msk.f32.vlgmr.msra.gmra.mxu1 %vm936_vm3, %v1123_v22  ;;  %3196 = vmatmul.mubr.msk.f32.vlgmr.msra.gmra.mxu0 %vm936_vm3, %v1277_v23 }
 0x4a1   : > { %3199 = vmatpush3.xpose.msk.msra.mxu1 %vm936_vm3, %v1357_v16  ;;  %3200 = vmatprep.mubr.msk.f32.mxu1 %vm3422_vm2, %v3421_v36 }
 0x4a2   : > { %3208 = vmatprep.subr.mxu1 %v3421_v36  ;;  %3205 = vmatprep.mubr.msk.f32.mxu0 %vm3422_vm2, %v3421_v36 }
 0x4a4   : > { %3201 = vmatmul.mubr.msk.f32.vlgmr.msra.gmra.mxu1 %vm936_vm3, %v1355_v24 }
 0x4a5   : > { %3210 = vmatprep.mubr.msk.f32.mxu1 %vm3422_vm2, %v3421_v36 }
 0x55c   : > { %v3705_v25 = vpop.f32.mrf.mxu0 }
 0x55e   : > { %v3187_v26 = vpop.f32.mrf.mxu0 }
 0x560   : > { %v3707_v27 = vpop.f32.mrf.mxu1  ;;  %v1350_v28 = vpop.f32.mrf.mxu0 }
 0x561   : > { %v1432_v29 = vmul.f32 0.35355338, %v1350_v28 }
 0x562   : > { %v3192_v30 = vpop.f32.mrf.mxu1  ;;  %v3197_v31 = vpop.f32.mrf.mxu0 }
 0x563   : > { %v1434_v33 = vadd.f32 %v1432_v29, %v3671_v54 }
 0x564   : > { %v1428_v34 = vpop.f32.mrf.mxu1 }
 0x565   : > { %v1433_v37 = vmul.f32 0.35355338, %v1428_v34  ;;  %v1436_v38 = vsel %vm936_vm3, %v1434_v33, -inf }
 0x566   : > { %v3202_v39 = vpop.f32.mrf.mxu1  ;;  %1437 = vmax.xlane.f32.xlu1 %v1436_v38 }
 0x567   : > { %v1435_v42 = vadd.f32 %v1433_v37, %v3674_v60 }
 0x569   : > { %v1439_v43 = vsel %vm936_vm3, %v1435_v42, -inf }
 0x56a   : > { %1440 = vmax.xlane.f32.xlu0 %v1439_v43 }
 0x577   : > { %1458 = vrot.lane.b32.xlu1 %v3650_v40, %s3428_s24 }
 0x57b   : > { %1612 = vrot.lane.b32.xlu1 %v3650_v40, %s3429_s25 }
 0x57f   : > { %1690 = vrot.lane.b32.xlu1 %v3653_v41, %s3429_s25 }
 0x580   : > { %1534 = vrot.lane.b32.xlu0 %v3653_v41, %s3428_s24  ;;  %s3950_s24 = scalar_lea.vmem %s3918_s10, %s3552_s20 }
 0x584   : > { %1610 = vrot.lane.b32.xlu0 %v3650_v40, %s3430_s3 }
 0x5ef   : > { %v1438_v44 = vpop.xlane.xlu1 %1437 }
 0x5f0   : > { %v1442_v45 = vsub.f32 %v1434_v33, %v1438_v44 }
 0x5f2   : > { %v1444_v46 = vmul.f32 1.442695, %v1442_v45 }
 0x5f3   : > { %v1459_v47 = vpop.permute.xlu1 %1458  ;;  %v1441_v48 = vpop.xlane.xlu0 %1440 }
 0x5f4   : > { %3371 = vpow2.f32 %v1444_v46  ;;  %v1443_v49 = vsub.f32 %v1435_v42, %v1441_v48  ;;  %3204 = vmatpush3.msra.mxu0 %v1459_v47 }
 0x5f5   : > { %3213 = vmatprep.subr.mxu0 %v3421_v36 }
 0x5f6   : > { %v1446_v50 = vmul.f32 1.442695, %v1443_v49 }
 0x5f7   : > { %v1535_v51 = vpop.permute.xlu0 %1534  ;;  %v1613_v57 = vpop.permute.xlu1 %1612 }
 0x5f8   : > { %3373 = vpow2.f32 %v1446_v50  ;;  %3209 = vmatpush3.msra.mxu1 %v1535_v51 }
 0x5f9   : > { %3218 = vmatprep.subr.mxu1 %v3421_v36 }
 0x5fb   : > { %v1691_v58 = vpop.permute.xlu1 %1690  ;;  %v1611_v2 = vpop.permute.xlu0 %1610 }
 0x601   : > { %v3372_v52 = vpop.eup %3371 }
 0x602   : > { %v1448_v53 = vsel %vm936_vm3, %v3372_v52, 0.0 }
 0x603   : > { %1449 = vadd.xlane.f32.xlu1 %v1448_v53 }
 0x605   : > { %v3374_v55 = vpop.eup %3373 }
 0x606   : > { %v1451_v56 = vsel %vm936_vm3, %v3374_v55, 0.0 }
 0x607   : > { %1452 = vadd.xlane.f32.xlu1 %v1451_v56 }
 0x618   : > { %1688 = vrot.lane.b32.xlu1 %v3653_v41, %s3430_s3 }
 0x68c   : > { %v1450_v59 = vpop.xlane.xlu1 %1449 }
 0x68d   : > { %3375 = vrcp.f32 %v1450_v59 }
 0x690   : > { %v1453_v61 = vpop.xlane.xlu1 %1452 }
 0x691   : > { %3377 = vrcp.f32 %v1453_v61 }
 0x694   : > { %v1689_v3 = vpop.permute.xlu1 %1688 }
 0x69a   : > { %v3376_v62 = vpop.eup %3375 }
 0x69b   : > { %v1456_v63 = vmul.f32 %v3376_v62, %v3372_v52 }
 0x69d   : > { %3206 = vmatmul.mubr.msk.f32.vlgmr.msra.gmra.mxu0 %vm936_vm3, %v1456_v63 }
 0x69e   : > { %v3378_v0 = vpop.eup %3377  ;;  %3214 = vmatpush3.xpose.msk.msra.mxu0 %vm936_vm3, %v1613_v57  ;;  %3215 = vmatprep.mubr.msk.f32.mxu0 %vm3422_vm2, %v3421_v36 }
 0x69f   : > { %v1457_v1 = vmul.f32 %v3378_v0, %v3374_v55  ;;  %3223 = vmatprep.subr.mxu0 %v3421_v36 }
 0x6a1   : > { %3211 = vmatmul.mubr.msk.f32.vlgmr.msra.gmra.mxu1 %vm936_vm3, %v1457_v1  ;;  %3216 = vmatmul.mubr.msk.f32.vlgmr.msra.gmra.mxu0 %vm936_vm3, %v1611_v2 }
 0x6a2   : > { %3219 = vmatpush3.xpose.msk.msra.mxu1 %vm936_vm3, %v1691_v58  ;;  %3220 = vmatprep.mubr.msk.f32.mxu1 %vm3422_vm2, %v3421_v36 }
 0x6a3   : > { %3228 = vmatprep.subr.mxu1 %v3421_v36  ;;  %3225 = vmatprep.mubr.msk.f32.mxu0 %vm3422_vm2, %v3421_v36 }
 0x6a5   : > { %3221 = vmatmul.mubr.msk.f32.vlgmr.msra.gmra.mxu1 %vm936_vm3, %v1689_v3 }
 0x6a6   : > { %3230 = vmatprep.mubr.msk.f32.mxu1 %vm3422_vm2, %v3421_v36 }
 0x75d   : > { %v3739_v4 = vpop.f32.mrf.mxu0 }
 0x75f   : > { %v3207_v5 = vpop.f32.mrf.mxu0 }
 0x761   : > { %v3741_v6 = vpop.f32.mrf.mxu1  ;;  %v1684_v7 = vpop.f32.mrf.mxu0 }
 0x762   : > { %v1766_v8 = vmul.f32 0.35355338, %v1684_v7 }
 0x763   : > { %v3212_v9 = vpop.f32.mrf.mxu1  ;;  %v3217_v10 = vpop.f32.mrf.mxu0 }
 0x764   : > { %v1768_v11 = vadd.f32 %v1766_v8, %v3671_v54 }
 0x765   : > { %v1762_v12 = vpop.f32.mrf.mxu1 }
 0x766   : > { %v1767_v13 = vmul.f32 0.35355338, %v1762_v12  ;;  %v1770_v14 = vsel %vm936_vm3, %v1768_v11, -inf }
 0x767   : > { %v3222_v15 = vpop.f32.mrf.mxu1  ;;  %1771 = vmax.xlane.f32.xlu0 %v1770_v14  ;;  %v2312_v14 = vld [vmem:[%s3567_s27 + $0x10] sm:$0xff] }
 0x768   : > { %v1769_v16 = vadd.f32 %v1767_v13, %v3674_v60  ;;  %v2313_v13 = vld [vmem:[%s3567_s27 + $0x18] sm:$0xff]  ;;  %v2310_v15 = vld [vmem:[%s3567_s27] sm:$0xff] }
 0x76a   : > { %v1773_v17 = vsel %vm936_vm3, %v1769_v16, -inf }
 0x76b   : > { %1774 = vmax.xlane.f32.xlu1 %v1773_v17 }
 0x77c   : > { %1792 = vrot.lane.b32.xlu1 %v3650_v40, %s3431_s26 }
 0x77d   : > { %1868 = vrot.lane.b32.xlu0 %v3653_v41, %s3431_s26  ;;  %s3951_s26 = scalar_lea.vmem %s3919_s11, %s3552_s20 }
 0x780   : > { %1946 = vrot.lane.b32.xlu1 %v3650_v40, %s3432_s4 }
 0x784   : > { %2024 = vrot.lane.b32.xlu1 %v3653_v41, %s3432_s4 }
 0x788   : > { %2022 = vrot.lane.b32.xlu1 %v3653_v41, %s3433_s29 }
 0x7f0   : > { %v1772_v18 = vpop.xlane.xlu0 %1771 }
 0x7f1   : > { %v1776_v19 = vsub.f32 %v1768_v11, %v1772_v18 }
 0x7f3   : > { %v1778_v20 = vmul.f32 1.442695, %v1776_v19 }
 0x7f4   : > { %v1775_v21 = vpop.xlane.xlu1 %1774  ;;  %v1869_v22 = vpop.permute.xlu0 %1868 }
 0x7f5   : > { %3379 = vpow2.f32 %v1778_v20  ;;  %v1777_v23 = vsub.f32 %v1769_v16, %v1775_v21  ;;  %3229 = vmatpush3.msra.mxu1 %v1869_v22 }
 0x7f6   : > { %3238 = vmatprep.subr.mxu1 %v3421_v36 }
 0x7f7   : > { %v1780_v24 = vmul.f32 1.442695, %v1777_v23 }
 0x7f8   : > { %v1793_v26 = vpop.permute.xlu1 %1792 }
 0x7f9   : > { %3381 = vpow2.f32 %v1780_v24  ;;  %3224 = vmatpush3.msra.mxu0 %v1793_v26 }
 0x7fa   : > { %3233 = vmatprep.subr.mxu0 %v3421_v36 }
 0x7fc   : > { %v1947_v37 = vpop.permute.xlu1 %1946 }
 0x800   : > { %v2025_v43 = vpop.permute.xlu1 %2024 }
 0x802   : > { %v3380_v28 = vpop.eup %3379 }
 0x803   : > { %v1782_v29 = vsel %vm936_vm3, %v3380_v28, 0.0 }
 0x804   : > { %1783 = vadd.xlane.f32.xlu0 %v1782_v29  ;;  %v2023_v46 = vpop.permute.xlu1 %2022 }
 0x806   : > { %v3382_v30 = vpop.eup %3381 }
 0x807   : > { %v1785_v31 = vsel %vm936_vm3, %v3382_v30, 0.0 }
 0x808   : > { %1786 = vadd.xlane.f32.xlu0 %v1785_v31 }
 0x81e   : > { %1944 = vrot.lane.b32.xlu0 %v3650_v40, %s3433_s29  ;;  %s3952_s29 = scalar_lea.vmem %s3920_s12, %s3552_s20 }
 0x88d   : > { %v1784_v33 = vpop.xlane.xlu0 %1783 }
 0x88e   : > { %3383 = vrcp.f32 %v1784_v33 }
 0x891   : > { %v1787_v34 = vpop.xlane.xlu0 %1786 }
 0x892   : > { %3385 = vrcp.f32 %v1787_v34 }
 0x895   : > { %v1945_v45 = vpop.permute.xlu0 %1944 }
 0x89b   : > { %v3384_v38 = vpop.eup %3383 }
 0x89c   : > { %v1790_v39 = vmul.f32 %v3384_v38, %v3380_v28 }
 0x89e   : > { %3226 = vmatmul.mubr.msk.f32.vlgmr.msra.gmra.mxu0 %vm936_vm3, %v1790_v39 }
 0x89f   : > { %v3386_v42 = vpop.eup %3385  ;;  %3234 = vmatpush3.xpose.msk.msra.mxu0 %vm936_vm3, %v1947_v37  ;;  %3235 = vmatprep.mubr.msk.f32.mxu0 %vm3422_vm2, %v3421_v36 }
 0x8a0   : > { %v1791_v44 = vmul.f32 %v3386_v42, %v3382_v30  ;;  %3243 = vmatprep.subr.mxu0 %v3421_v36 }
 0x8a2   : > { %3231 = vmatmul.mubr.msk.f32.vlgmr.msra.gmra.mxu1 %vm936_vm3, %v1791_v44  ;;  %3236 = vmatmul.mubr.msk.f32.vlgmr.msra.gmra.mxu0 %vm936_vm3, %v1945_v45 }
 0x8a3   : > { %3239 = vmatpush3.xpose.msk.msra.mxu1 %vm936_vm3, %v2025_v43  ;;  %3240 = vmatprep.mubr.msk.f32.mxu1 %vm3422_vm2, %v3421_v36 }
 0x8a4   : > { %3248 = vmatprep.subr.mxu1 %v3421_v36  ;;  %3245 = vmatprep.mubr.msk.f32.mxu0 %vm3422_vm2, %v3421_v36 }
 0x8a6   : > { %3241 = vmatmul.mubr.msk.f32.vlgmr.msra.gmra.mxu1 %vm936_vm3, %v2023_v46 }
 0x8a7   : > { %3250 = vmatprep.mubr.msk.f32.mxu1 %vm3422_vm2, %v3421_v36 }
 0x95e   : > { %v1864_v47 = vpop.f32.mrf.mxu0 }
 0x960   : > { %v3227_v48 = vpop.f32.mrf.mxu0 }
 0x962   : > { %v1940_v49 = vpop.f32.mrf.mxu1  ;;  %v2018_v50 = vpop.f32.mrf.mxu0 }
 0x963   : > { %v2100_v51 = vmul.f32 0.35355338, %v2018_v50 }
 0x964   : > { %v3232_v52 = vpop.f32.mrf.mxu1  ;;  %v3237_v53 = vpop.f32.mrf.mxu0 }
 0x965   : > { %v2102_v55 = vadd.f32 %v2100_v51, %v3671_v54 }
 0x966   : > { %v2096_v56 = vpop.f32.mrf.mxu1 }
 0x967   : > { %v2101_v57 = vmul.f32 0.35355338, %v2096_v56  ;;  %v2104_v58 = vsel %vm936_vm3, %v2102_v55, -inf  ;;  %v2451_v56 = vld [vmem:[%s3584_s7 + $0x10] sm:$0xff] }
 0x968   : > { %v3242_v59 = vpop.f32.mrf.mxu1  ;;  %2105 = vmax.xlane.f32.xlu0 %v2104_v58  ;;  %v2449_v58 = vld [vmem:[%s3584_s7] sm:$0xff] }
 0x969   : > { %v2103_v61 = vadd.f32 %v2101_v57, %v3674_v60  ;;  %v2450_v57 = vld [vmem:[%s3584_s7 + $0x8] sm:$0xff] }
 0x96b   : > { %v2107_v62 = vsel %vm936_vm3, %v2103_v61, -inf }
 0x96c   : > { %2108 = vmax.xlane.f32.xlu1 %v2107_v62 }
 0x97d   : > { %2126 = vrot.lane.b32.xlu1 %v3650_v40, %s3434_s2 }
 0x981   : > { %2280 = vrot.lane.b32.xlu1 %v3739_v4, %s3435_s5 }
 0x985   : > { %2282 = vrot.lane.b32.xlu1 %v3741_v6, %s3435_s5 }
 0x989   : > { %2290 = vrot.lane.b32.xlu1 %v1940_v49, %s3436_s19 }
 0x9f1   : > { %v2106_v36 = vpop.xlane.xlu0 %2105 }
 0x9f2   : > { %v2110_v54 = vsub.f32 %v2102_v55, %v2106_v36  ;;  %v2452_v55 = vld [vmem:[%s3584_s7 + $0x18] sm:$0xff] }
 0x9f4   : > { %v2112_v63 = vmul.f32 1.442695, %v2110_v54 }
 0x9f5   : > { %v2109_v0 = vpop.xlane.xlu1 %2108 }
 0x9f6   : > { %3387 = vpow2.f32 %v2112_v63  ;;  %v2111_v1 = vsub.f32 %v2103_v61, %v2109_v0 }
 0x9f8   : > { %v2114_v60 = vmul.f32 1.442695, %v2111_v1  ;;  %v3066_v1 = vld [vmem:[%s3951_s26] ss:$0 sm:$0xff] }
 0x9f9   : > { %v2127_v2 = vpop.permute.xlu1 %2126 }
 0x9fa   : > { %3389 = vpow2.f32 %v2114_v60  ;;  %3244 = vmatpush3.msra.mxu0 %v2127_v2  ;;  %v3067_v2 = vld [vmem:[%s3952_s29] ss:$0 sm:$0xff]  ;;  %s3954_s29 = sld [smem:[#allocation10_spill]] (!%p3074_p5) }
 0x9fd   : > { %v2281_v20 = vpop.permute.xlu1 %2280 }
 0x9fe   : > { %v2302_v23 = vsel %vm936_vm3, %v3705_v25, %v2281_v20  ;;  %v3063_v25 = vld [vmem:[%s3950_s24] ss:$0 sm:$0xff]  ;;  %v2561_v20 = vld [vmem:[%s3594_s0 + $0x10] sm:$0xff]  ;;  %s3953_s24 = sld [smem:[#allocation8_spill]] (!%p3074_p5) }
 0xa01   : > { %v2283_v21 = vpop.permute.xlu1 %2282 }
 0xa02   : > { %v2303_v30 = vsel %vm936_vm3, %v3707_v27, %v2283_v21  ;;  %v2560_v21 = vld [vmem:[%s3594_s0 + $0x8] sm:$0xff] }
 0xa03   : > { %v3388_v3 = vpop.eup %3387 }
 0xa04   : > { %v2116_v40 = vsel %vm936_vm3, %v3388_v3, 0.0 }
 0xa05   : > { %2117 = vadd.xlane.f32.xlu0 %v2116_v40  ;;  %v2291_v24 = vpop.permute.xlu1 %2290 }
 0xa06   : > { %v2306_v31 = vsel %vm2304_vm5, %v2303_v30, %v2291_v24 }
 0xa07   : > { %v3390_v5 = vpop.eup %3389 }
 0xa08   : > { %v2119_v4 = vsel %vm936_vm3, %v3390_v5, 0.0 }
 0xa09   : > { %2120 = vadd.xlane.f32.xlu0 %v2119_v4 }
 0xa1f   : > { %2202 = vrot.lane.b32.xlu0 %v3653_v41, %s3434_s2  ;;  %v2311_v41 = vld [vmem:[%s3567_s27 + $0x8] sm:$0xff] }
 0xa23   : > { %2288 = vrot.lane.b32.xlu0 %v1864_v47, %s3436_s19 }
 0xa8e   : > { %v2118_v6 = vpop.xlane.xlu0 %2117 }
 0xa8f   : > { %3391 = vrcp.f32 %v2118_v6 }
 0xa92   : > { %v2121_v7 = vpop.xlane.xlu0 %2120 }
 0xa93   : > { %3393 = vrcp.f32 %v2121_v7 }
 0xa96   : > { %v2203_v8 = vpop.permute.xlu0 %2202 }
 0xa97   : > { %3249 = vmatpush3.msra.mxu1 %v2203_v8  ;;  %v2574_v8 = vld [vmem:[%s3594_s0 + $0x78] sm:$0xff] }
 0xa98   : > { %3253 = vmatprep.subr.mxu1 %v2313_v13  ;;  %3275 = vmatprep.subr.mxu0 %v2574_v8 }
 0xa9a   : > { %v2289_v22 = vpop.permute.xlu0 %2288 }
 0xa9b   : > { %v2305_v26 = vsel %vm2304_vm5, %v2302_v23, %v2289_v22  ;;  %v2559_v22 = vld [vmem:[%s3594_s0] sm:$0xff] }
 0xa9c   : > { %v3392_v9 = vpop.eup %3391  ;;  %v3068_v23 = vld [vmem:[%s745_s9] ss:$0 sm:$0xff] }
 0xa9d   : > { %v2124_v10 = vmul.f32 %v3392_v9, %v3388_v3  ;;  %v2573_v9 = vld [vmem:[%s3594_s0 + $0x70] sm:$0xff] }
 0xa9f   : > { %3246 = vmatmul.mubr.msk.f32.vlgmr.msra.gmra.mxu0 %vm936_vm3, %v2124_v10  ;;  %v2572_v10 = vld [vmem:[%s3594_s0 + $0x68] sm:$0xff] }
 0xaa0   : > { %v3394_v11 = vpop.eup %3393  ;;  %3276 = vmatpush3.msra.mxu0 %v2574_v8 }
 0xaa1   : > { %v2125_v12 = vmul.f32 %v3394_v11, %v3390_v5  ;;  %3277 = vmatprep.subr.mxu0 %v2573_v9  ;;  %v2571_v11 = vld [vmem:[%s3594_s0 + $0x60] sm:$0xff] }
 0xaa2   : > { %3278 = vmatpush3.msra.mxu0 %v2573_v9  ;;  %v3072_v9 = vld [vmem:[%s756_s23] ss:$0 sm:$0xff]  ;;  %s3955_s23 = sld [smem:[#allocation9_spill]] (!%p3074_p5) }
 0xaa3   : > { %3251 = vmatmul.mubr.msk.f32.vlgmr.msra.gmra.mxu1 %vm936_vm3, %v2125_v12  ;;  %3279 = vmatprep.subr.mxu0 %v2572_v10  ;;  %v2570_v12 = vld [vmem:[%s3594_s0 + $0x58] sm:$0xff] }
 0xaa4   : > { %3254 = vmatpush3.msra.mxu1 %v2313_v13  ;;  %3280 = vmatpush3.msra.mxu0 %v2572_v10  ;;  %v2569_v13 = vld [vmem:[%s3594_s0 + $0x50] sm:$0xff] }
 0xaa5   : > { %3255 = vmatprep.subr.mxu1 %v2312_v14  ;;  %3281 = vmatprep.subr.mxu0 %v2571_v11 }
 0xaa6   : > { %3256 = vmatpush3.msra.mxu1 %v2312_v14  ;;  %3282 = vmatpush3.msra.mxu0 %v2571_v11  ;;  %v2568_v14 = vld [vmem:[%s3594_s0 + $0x48] sm:$0xff] }
 0xaa7   : > { %3257 = vmatprep.subr.mxu1 %v2311_v41  ;;  %3283 = vmatprep.subr.mxu0 %v2570_v12 }
 0xaa8   : > { %3258 = vmatpush3.msra.mxu1 %v2311_v41  ;;  %3284 = vmatpush3.msra.mxu0 %v2570_v12  ;;  %v2567_v41 = vld [vmem:[%s3594_s0 + $0x40] sm:$0xff] }
 0xaa9   : > { %3259 = vmatprep.subr.mxu1 %v2310_v15  ;;  %3285 = vmatprep.subr.mxu0 %v2569_v13  ;;  %v3073_v12 = vld [vmem:[%s759_s6] ss:$0 sm:$0xff]  ;;  %s3956_s6 = sld [smem:[#allocation13_spill]] (!%p3074_p5) }
 0xaaa   : > { %3260 = vmatpush3.msra.mxu1 %v2310_v15  ;;  %3286 = vmatpush3.msra.mxu0 %v2569_v13  ;;  %v2566_v15 = vld [vmem:[%s3594_s0 + $0x38] sm:$0xff] }
 0xaab   : > { %3264 = vmatprep.subr.mxu1 %v2452_v55  ;;  %3287 = vmatprep.subr.mxu0 %v2568_v14 }
 0xaac   : > { %3288 = vmatpush3.msra.mxu0 %v2568_v14 }
 0xaad   : > { %3289 = vmatprep.subr.mxu0 %v2567_v41 }
 0xaae   : > { %3290 = vmatpush3.msra.mxu0 %v2567_v41 }
 0xaaf   : > { %3291 = vmatprep.subr.mxu0 %v2566_v15 }
 0xab0   : > { %3292 = vmatpush3.msra.mxu0 %v2566_v15 }
 0xb5f   : > { %v2198_v16 = vpop.f32.mrf.mxu0 }
 0xb60   : > { %2296 = vrot.lane.b32.xlu0 %v2198_v16, %s3437_s22  ;;  %v2565_v16 = vld [vmem:[%s3594_s0 + $0x30] sm:$0xff] }
 0xb61   : > { %v3247_v17 = vpop.f32.mrf.mxu0  ;;  %3293 = vmatprep.subr.mxu0 %v2565_v16 }
 0xb62   : > { %v2564_v17 = vld [vmem:[%s3594_s0 + $0x28] sm:$0xff]  ;;  %3294 = vmatpush3.msra.mxu0 %v2565_v16 }
 0xb63   : > { %v2274_v18 = vpop.f32.mrf.mxu1  ;;  %3295 = vmatprep.subr.mxu0 %v2564_v17 }
 0xb64   : > { %2298 = vrot.lane.b32.xlu1 %v2274_v18, %s3437_s22  ;;  %v2563_v18 = vld [vmem:[%s3594_s0 + $0x20] sm:$0xff]  ;;  %3296 = vmatpush3.msra.mxu0 %v2564_v17 }
 0xb65   : > { %v3252_v19 = vpop.f32.mrf.mxu1  ;;  %3297 = vmatprep.subr.mxu0 %v2563_v18 }
 0xb66   : > { %v2562_v19 = vld [vmem:[%s3594_s0 + $0x18] sm:$0xff]  ;;  %3298 = vmatpush3.msra.mxu0 %v2563_v18 }
 0xb67   : > { %3299 = vmatprep.subr.mxu0 %v2562_v19 }
 0xb68   : > { %3300 = vmatpush3.msra.mxu0 %v2562_v19 }
 0xb69   : > { %3301 = vmatprep.subr.mxu0 %v2561_v20 }
 0xb6a   : > { %3302 = vmatpush3.msra.mxu0 %v2561_v20 }
 0xb6b   : > { %3303 = vmatprep.subr.mxu0 %v2560_v21 }
 0xb6c   : > { %3304 = vmatpush3.msra.mxu0 %v2560_v21 }
 0xb6d   : > { %3305 = vmatprep.subr.mxu0 %v2559_v22 }
 0xb6e   : > { %3306 = vmatpush3.msra.mxu0 %v2559_v22 }
 0xbd2   : > { %v2297_v28 = vpop.permute.xlu0 %2296 }
 0xbd3   : > { %v2308_v29 = vsel %vm2307_vm4, %v2305_v26, %v2297_v28 }
 0xbd4   : > { %3261 = vmatprep.mubr.msk.f32.mxu1 %vm827_vm1, %v2308_v29 }
 0xbd6   : > { %v2299_v33 = vpop.permute.xlu1 %2298 }
 0xbd7   : > { %v2309_v34 = vsel %vm2307_vm4, %v2306_v31, %v2299_v33 }
 0xbd8   : > { %3262 = vmatmul.mubr.msk.f32.vlgmr.msra.gmra.mxu1 %vm827_vm1, %v2309_v34 }
 0xbd9   : > { %3265 = vmatpush3.msra.mxu1 %v2452_v55 }
 0xbda   : > { %3266 = vmatprep.subr.mxu1 %v2451_v56 }
 0xbdb   : > { %3267 = vmatpush3.msra.mxu1 %v2451_v56 }
 0xbdc   : > { %3268 = vmatprep.subr.mxu1 %v2450_v57 }
 0xbdd   : > { %3269 = vmatpush3.msra.mxu1 %v2450_v57 }
 0xbde   : > { %3270 = vmatprep.subr.mxu1 %v2449_v58 }
 0xbdf   : > { %3271 = vmatpush3.msra.mxu1 %v2449_v58 }
 0xc98   : > { %v3263_v37 = vpop.f32.mrf.mxu1 }
 0xc99   : > { %v2399_v38 = vadd.f32 %v3263_v37, %v3063_v25 }
 0xc9a   : > { %v2393_v39 = vpop.f32.mrf.mxu1 }
 0xc9b   : > { %v2394_v42 = vadd.f32 %v3063_v25, %v2393_v39  ;;  %v2403_v43 = vadd.f32 %v2399_v38, %v3635_v35 }
 0xc9d   : > { %v2409_v44 = vsel %vm827_vm1, %v2403_v43, 0.0  ;;  %v2402_v27 = vadd.f32 %v2394_v42, %v3629_v32 }
 0xc9e   : > { %2410 = vadd.xlane.f32.xlu1 %v2409_v44 }
 0xc9f   : > { %v2406_v45 = vsel %vm827_vm1, %v2402_v27, 0.0 }
 0xca0   : > { %2407 = vadd.xlane.f32.xlu0 %v2406_v45 }
 0xd27   : > { %v2411_v46 = vpop.xlane.xlu1 %2410 }
 0xd28   : > { %v2414_v47 = vmul.f32 0.03125, %v2411_v46 }
 0xd29   : > { %v2408_v48 = vpop.xlane.xlu0 %2407 }
 0xd2a   : > { %v2413_v49 = vmul.f32 0.03125, %v2408_v48  ;;  %v2416_v50 = vsub.f32 %v2403_v43, %v2414_v47 }
 0xd2c   : > { %v2415_v51 = vsub.f32 %v2402_v27, %v2413_v49  ;;  %v2418_v53 = vmul.f32 %v2416_v50, %v2416_v50 }
 0xd2e   : > { %v2417_v52 = vmul.f32 %v2415_v51, %v2415_v51  ;;  %v2422_v32 = vsel %vm827_vm1, %v2418_v53, 0.0 }
 0xd30   : > { %v2419_v35 = vsel %vm827_vm1, %v2417_v52, 0.0 }
 0xd31   : > { %2420 = vadd.xlane.f32.xlu0 %v2419_v35 }
 0xd35   : > { %2423 = vadd.xlane.f32.xlu0 %v2422_v32 }
 0xdba   : > { %v2421_v59 = vpop.xlane.xlu0 %2420 }
 0xdbb   : > { %v2425_v61 = vmul.f32 0.03125, %v2421_v59 }
 0xdbd   : > { %v2427_v62 = vadd.f32 1e-12, %v2425_v61 }
 0xdbe   : > { %v2424_v36 = vpop.xlane.xlu0 %2423 }
 0xdbf   : > { %3395 = vrsqrt.f32 %v2427_v62  ;;  %v2426_v54 = vmul.f32 0.03125, %v2424_v36 }
 0xdc1   : > { %v2428_v63 = vadd.f32 1e-12, %v2426_v54 }
 0xdc3   : > { %3397 = vrsqrt.f32 %v2428_v63 }
 0xdcc   : > { %v3396_v0 = vpop.eup %3395 }
 0xdcd   : > { %v2431_v60 = vmul.f32 %v3396_v0, %v2415_v51  ;;  %v3071_v51 = vld [vmem:[%s753_s1] ss:$0 sm:$0xff] }
 0xdcf   : > { %v2439_v3 = vmul.f32 %v3066_v1, %v2431_v60 }
 0xdd0   : > { %v3398_v40 = vpop.eup %3397 }
 0xdd1   : > { %v2432_v5 = vmul.f32 %v3398_v40, %v2416_v50  ;;  %v3820_v4 = vadd.f32 %v3067_v2, %v2439_v3 }
 0xdd3   : > { %v2440_v6 = vmul.f32 %v3066_v1, %v2432_v5  ;;  %3272 = vmatprep.mubr.msk.f32.mxu1 %vm827_vm1, %v3820_v4 }
 0xdd5   : > { %v3824_v7 = vadd.f32 %v3067_v2, %v2440_v6 }
 0xdd7   : > { %3273 = vmatmul.mubr.msk.f32.vlgmr.msra.gmra.mxu1 %vm827_vm1, %v3824_v7 }
 0xe97   : > { %v3274_v24 = vpop.f32.mrf.mxu1 }
 0xe98   : > { %v2538_v26 = vadd.f32 %v3274_v24, %v3068_v23 }
 0xe99   : > { %v2532_v28 = vpop.f32.mrf.mxu1 }
 0xe9a   : > { %v2544_v29 = vmul.f32 0.044715, %v2538_v26  ;;  %v2533_v30 = vadd.f32 %v3068_v23, %v2532_v28  ;;  %v2542_v48 = vmul.f32 0.5, %v2538_v26 }
 0xe9c   : > { %v2546_v31 = vmul.f32 %v2544_v29, %v2538_v26  ;;  %v2543_v33 = vmul.f32 0.044715, %v2533_v30  ;;  %v2541_v46 = vmul.f32 0.5, %v2533_v30 }
 0xe9e   : > { %v2548_v34 = vmul.f32 %v2546_v31, %v2538_v26  ;;  %v2545_v25 = vmul.f32 %v2543_v33, %v2533_v30 }
 0xea0   : > { %v2550_v37 = vadd.f32 %v2548_v34, %v2538_v26  ;;  %v2547_v38 = vmul.f32 %v2545_v25, %v2533_v30 }
 0xea2   : > { %v2549_v39 = vadd.f32 %v2547_v38, %v2533_v30  ;;  %v2552_v42 = vmul.f32 0.7978846, %v2550_v37 }
 0xea4   : > { %v2551_v43 = vmul.f32 0.7978846, %v2549_v39  ;;  %3399 = vtanh.f32 %v2552_v42 }
 0xea6   : > { %3401 = vtanh.f32 %v2551_v43 }
 0xeb1   : > { %v3400_v44 = vpop.eup %3399 }
 0xeb2   : > { %v2556_v45 = vadd.f32 1.0, %v3400_v44 }
 0xeb3   : > { %v3402_v27 = vpop.eup %3401 }
 0xeb4   : > { %v2555_v47 = vadd.f32 1.0, %v3402_v27  ;;  %v2558_v50 = vmul.f32 %v2556_v45, %v2542_v48 }
 0xeb6   : > { %v2557_v49 = vmul.f32 %v2555_v47, %v2541_v46 }
 0xeb8   : > { %3307 = vmatprep.mubr.f32.mxu0 %v2557_v49 }
 0xeb9   : > { %3308 = vmatmul.mubr.f32.vlgmr.msra.gmra.mxu0 %v2558_v50 }
 0xf79   : > { %v3309_v52 = vpop.f32.mrf.mxu0 }
 0xf7a   : > { %v2654_v35 = vadd.f32 %v3309_v52, %v3071_v51 }
 0xf7b   : > { %v2648_v53 = vpop.f32.mrf.mxu0 }
 0xf7c   : > { %v2649_v32 = vadd.f32 %v3071_v51, %v2648_v53  ;;  %v2658_v55 = vadd.f32 %v2654_v35, %v3824_v7 }
 0xf7e   : > { %v2664_v56 = vsel %vm827_vm1, %v2658_v55, 0.0  ;;  %v2657_v57 = vadd.f32 %v2649_v32, %v3820_v4 }
 0xf7f   : > { %2665 = vadd.xlane.f32.xlu0 %v2664_v56 }
 0xf80   : > { %v2661_v58 = vsel %vm827_vm1, %v2657_v57, 0.0 }
 0xf81   : > { %2662 = vadd.xlane.f32.xlu1 %v2661_v58 }
0x1008   : > { %v2666_v59 = vpop.xlane.xlu0 %2665 }
0x1009   : > { %v2668_v61 = vmul.f32 0.03125, %v2666_v59 }
0x100a   : > { %v2663_v62 = vpop.xlane.xlu1 %2662 }
0x100b   : > { %v2670_v36 = vsub.f32 %v2658_v55, %v2668_v61  ;;  %v2667_v54 = vmul.f32 0.03125, %v2663_v62 }
0x100d   : > { %v2669_v63 = vsub.f32 %v2657_v57, %v2667_v54  ;;  %v2672_v0 = vmul.f32 %v2670_v36, %v2670_v36 }
0x100f   : > { %v2676_v1 = vsel %vm827_vm1, %v2672_v0, 0.0  ;;  %v2671_v60 = vmul.f32 %v2669_v63, %v2669_v63 }
0x1010   : > { %2677 = vadd.xlane.f32.xlu0 %v2676_v1 }
0x1011   : > { %v2673_v2 = vsel %vm827_vm1, %v2671_v60, 0.0 }
0x1012   : > { %2674 = vadd.xlane.f32.xlu1 %v2673_v2 }
0x1099   : > { %v2678_v3 = vpop.xlane.xlu0 %2677 }
0x109a   : > { %v2680_v40 = vmul.f32 0.03125, %v2678_v3 }
0x109b   : > { %v2675_v5 = vpop.xlane.xlu1 %2674 }
0x109c   : > { %v2682_v4 = vadd.f32 1e-12, %v2680_v40  ;;  %v2679_v6 = vmul.f32 0.03125, %v2675_v5 }
0x109e   : > { %3403 = vrsqrt.f32 %v2682_v4  ;;  %v2681_v7 = vadd.f32 1e-12, %v2679_v6 }
0x10a0   : > { %3405 = vrsqrt.f32 %v2681_v7 }
0x10ab   : > { %v3404_v8 = vpop.eup %3403 }
0x10ac   : > { %v2686_v10 = vmul.f32 %v3404_v8, %v2670_v36 }
0x10ad   : > { %v3406_v11 = vpop.eup %3405 }
0x10ae   : > { %v2694_v13 = vmul.f32 %v3072_v9, %v2686_v10  ;;  %v2685_v14 = vmul.f32 %v3406_v11, %v2669_v63 }
0x10b0   : > { %v2702_v41 = vadd.f32 %v3073_v12, %v2694_v13  ;;  %v2693_v15 = vmul.f32 %v3072_v9, %v2685_v14  ;;  %2708 = sbr.rel (%p3074_p5) target bundleno = 4723 (0x1273), region = 104 }
0x10b2   : > { %2704 = vst.msk [vmem:[#allocation2 + $0x8] sm:$0xff] %vm827_vm1, %v2702_v41  ;;  %v2701_v16 = vadd.f32 %v3073_v12, %v2693_v15 }
0x10b4   : > { %2703 = vst.msk [vmem:[#allocation2] sm:$0xff] %vm827_vm1, %v2701_v16 }
0x10b5   : > { %v2717_v17 = vld [vmem:[%s3953_s24 + $0x18] sm:$0xff]  ;;  %v3438_v18 = vmov 0.0   ;;  %v2716_v19 = vld [vmem:[%s3953_s24 + $0x10] sm:$0xff]  ;;  %vm3439_vm6 = vmmov 0   ;;  %v2710_v20 = vrot.slane %v2702_v41, 7  ;;  %v2715_v21 = vld [vmem:[%s3953_s24 + $0x8] sm:$0xff] }
0x10b6   : > { %3310 = vmatprep.subr.mxu0 %v3438_v18  ;;  %3318 = vmatprep.mubr.msk.f32.mxu0 %vm3439_vm6, %v3438_v18  ;;  %vm2712_vm7 = vcmask 1040384   ;;  %v2714_v22 = vld [vmem:[%s3953_s24] sm:$0xff]  ;;  %v2802_v24 = vld [vmem:[%s3954_s29 + $0x18] sm:$0xff]  ;;  %v2801_v26 = vld [vmem:[%s3954_s29 + $0x10] sm:$0xff]  ;;  %vm2882_vm8 = vcmask 1024  }
0x10b7   : > { %3311 = vmatpush3.msra.mxu0 %v2717_v17  ;;  %3321 = vmatprep.subr.mxu1 %v3438_v18  ;;  %v2713_v23 = vsel %vm2712_vm7, %v2701_v16, %v2710_v20  ;;  %v2800_v28 = vld [vmem:[%s3954_s29 + $0x8] sm:$0xff]  ;;  %v2799_v29 = vld [vmem:[%s3954_s29] sm:$0xff] }
0x10b8   : > { %3312 = vmatprep.subr.mxu0 %v3438_v18  ;;  %3329 = vmatprep.mubr.msk.f32.mxu1 %vm3439_vm6, %v3438_v18  ;;  %v3075_v30 = vld [vmem:[%s3955_s23] ss:$0 sm:$0xff] }
0x10b9   : > { %3313 = vmatpush3.msra.mxu0 %v2716_v19  ;;  %3322 = vmatpush3.msra.mxu1 %v2802_v24 }
0x10ba   : > { %3314 = vmatprep.subr.mxu0 %v3438_v18  ;;  %3323 = vmatprep.subr.mxu1 %v3438_v18 }
0x10bb   : > { %3315 = vmatpush3.msra.mxu0 %v2715_v21  ;;  %3324 = vmatpush3.msra.mxu1 %v2801_v26 }
0x10bc   : > { %3316 = vmatprep.subr.mxu0 %v3438_v18  ;;  %3325 = vmatprep.subr.mxu1 %v3438_v18 }
0x10bd   : > { %3317 = vmatpush3.msra.mxu0 %v2714_v22  ;;  %3326 = vmatpush3.msra.mxu1 %v2800_v28 }
0x10be   : > { %3319 = vmatmul.mubr.msk.f32.vlgmr.msra.gmra.mxu0 %vm827_vm1, %v2713_v23  ;;  %3327 = vmatprep.subr.mxu1 %v3438_v18 }
0x10bf   : > { %3328 = vmatpush3.msra.mxu1 %v2799_v29 }
0x117e   : > { %v2794_v31 = vpop.f32.mrf.mxu0 }
0x117f   : > { %v2795_v33 = vadd.f32 %v3075_v30, %v2794_v31 }
0x1180   : > { %v3320_v34 = vpop.f32.mrf.mxu0 }
0x1181   : > { %3407 = vtanh.f32 %v2795_v33 }
0x118e   : > { %v3408_v25 = vpop.eup %3407 }
0x118f   : > { %3330 = vmatmul.mubr.msk.f32.vlgmr.msra.gmra.mxu1 %vm827_vm1, %v3408_v25 }
0x124f   : > { %v2872_v37 = vpop.f32.mrf.mxu1 }
0x1250   : > { %v2876_v38 = vsub.f32 0.0, %v2872_v37 }
0x1251   : > { %v3331_v39 = vpop.f32.mrf.mxu1 }
0x1252   : > { %v2877_v42 = vmul.f32 1.442695, %v2876_v38 }
0x1254   : > { %3409 = vpow2.f32 %v2877_v42 }
0x1261   : > { %v3410_v43 = vpop.eup %3409 }
0x1262   : > { %v2879_v44 = vadd.f32 1.0, %v3410_v43 }
0x1264   : > { %3411 = vrcp.f32 %v2879_v44 }
0x1271   : > { %v3412_v27 = vpop.eup %3411 }
0x1272   : > { %2883 = vst.msk [vmem:[%s3956_s6] sm:$0x3] %vm2882_vm8, %v3412_v27 }
0x1273 PF: > { %s3957_s25 = sld [smem:[#allocation3_spill]] }
0x1279   : > { %s29_s0 = sadd.s32 1, %s3957_s25  }
0x127a   : > { %p26_p6 = scmp.ge.s32.totalorder %s29_s0, 4  }
0x127c   :  { %28 = sbr.rel (!%p26_p6) target bundleno = 11 (0xb), region = 163 }

</bundles_post_ra>
